<compile_context>
chip_gen: v5e
topology: v5e:2x2
jax: 0.10.0
libtpu: 0.0.40
codegen_flags: <defaults>
</compile_context>

<pallas_src>
import jax
import jax.numpy as jnp
from jax import lax
from jax.experimental import pallas as pl
from jax.experimental.pallas import tpu as pltpu


def _make_gru_model_kernel(T, B, D, H, O, L):
    """Build the fused kernel for L stacked GRU layers followed by the FC head."""

    def run_layer(in_ref, seq_out_ref, w_ih, w_hh, bx, bhn):
        """Recurrence over T for one layer. Returns the final hidden state (B, H)."""

        def step(t, h):
            x_t = in_ref[t]                                                     # (B, D_in)
            gi = jnp.dot(x_t, w_ih, preferred_element_type=jnp.float32) + bx    # (B, 3H)
            gh = jnp.dot(h,   w_hh, preferred_element_type=jnp.float32)         # (B, 3H)
            r = jax.nn.sigmoid(gi[:, :H]        + gh[:, :H])
            z = jax.nn.sigmoid(gi[:, H:2 * H]   + gh[:, H:2 * H])
            n = jnp.tanh(gi[:, 2 * H:] + r * (gh[:, 2 * H:] + bhn))
            h_new = n + z * (h - n)                  # == (1 - z) * n + z * h
            if seq_out_ref is not None:
                seq_out_ref[t] = h_new               # keep sequence for next layer
            return h_new

        h0 = jnp.zeros((B, H), jnp.float32)
        return lax.fori_loop(0, T, step, h0, unroll=True)

    def kernel(*refs):
        # refs = (x, [w_ih, w_hh, bx, bhn] * L, w_fc, b_fc, out, seq_scratch...)
        x_ref = refs[0]
        layer_refs = refs[1:1 + 4 * L]
        w_fc_ref = refs[1 + 4 * L]
        b_fc_ref = refs[2 + 4 * L]
        out_ref = refs[3 + 4 * L]
        seq_scratch = refs[4 + 4 * L:]

        cur_in = x_ref
        h_last = None
        for l in range(L):
            w_ih = layer_refs[4 * l + 0][...]        # (D_in, 3H) resident in vregs
            w_hh = layer_refs[4 * l + 1][...]        # (H, 3H)
            bx = layer_refs[4 * l + 2][...]          # (1, 3H)  fused r/z bias + b_in
            bhn = layer_refs[4 * l + 3][...]         # (1, H)   b_hn
            seq_out = seq_scratch[l % 2] if l < L - 1 else None
            h_last = run_layer(cur_in, seq_out, w_ih, w_hh, bx, bhn)
            cur_in = seq_out

        # FC head on the last time step's hidden state.
        out_ref[...] = (jnp.dot(h_last, w_fc_ref[...],
                                preferred_element_type=jnp.float32)
                        + b_fc_ref[...]).astype(out_ref.dtype)

    return kernel


def gru_model_forward(x_btd, gru_params, w_fc, b_fc):
    """x_btd: (B, T, D) batch-first, like the PyTorch module input.

    gru_params: list of (w_ih (3, D_in, H), w_hh (3, H, H), b_ih (3, 1, H), b_hh (3, 1, H))
    in PyTorch gate order (r, z, n).
    """
    B, T, D = x_btd.shape
    H = gru_params[0][1].shape[-1]
    O = w_fc.shape[-1]
    L = len(gru_params)

    x_tbd = jnp.transpose(x_btd, (1, 0, 2)).astype(jnp.float32)   # time-major (T, B, D)

    # Pack per-layer params lane-dense: W:(D_in, 3H)/(H, 3H), fused r/z bias.
    packed = []
    for (w_ih, w_hh, b_ih, b_hh) in gru_params:
        w_ih_p = jnp.concatenate([w_ih[0], w_ih[1], w_ih[2]], axis=-1)          # (D_in, 3H)
        w_hh_p = jnp.concatenate([w_hh[0], w_hh[1], w_hh[2]], axis=-1)          # (H, 3H)
        bx = jnp.concatenate([b_ih[0] + b_hh[0],                                # r
                              b_ih[1] + b_hh[1],                                # z
                              b_ih[2]], axis=-1)                                # n (input part)
        bhn = b_hh[2]                                                           # (1, H)
        packed += [w_ih_p, w_hh_p, bx, bhn]

    n_seq_scratch = min(L - 1, 2)                    # ping-pong inter-layer sequences
    vmem = pl.BlockSpec(memory_space=pltpu.MemorySpace.VMEM)
    kernel = _make_gru_model_kernel(T, B, D, H, O, L)

    return pl.pallas_call(
        kernel,
        out_shape=jax.ShapeDtypeStruct((B, O), jnp.float32),
        in_specs=[vmem] * (1 + 4 * L + 2),
        out_specs=vmem,
        scratch_shapes=[pltpu.VMEM((T, B, H), jnp.float32)
                        for _ in range(n_seq_scratch)],
    )(x_tbd, *packed, w_fc, b_fc)


def gru_model_reference(x_btd, gru_params, w_fc, b_fc):
    """Pure-JAX reference (same math, unpacked params) for correctness checking."""
    seq = jnp.transpose(x_btd, (1, 0, 2))
    for (w_ih, w_hh, b_ih, b_hh) in gru_params:
        B = seq.shape[1]
        H = w_hh.shape[-1]

        def step(h, x_t):
            gi = jnp.einsum('bd,gdh->gbh', x_t, w_ih) + b_ih
            gh = jnp.einsum('bh,ghk->gbk', h, w_hh) + b_hh
            r = jax.nn.sigmoid(gi[0] + gh[0])
            z = jax.nn.sigmoid(gi[1] + gh[1])
            n = jnp.tanh(gi[2] + r * gh[2])
            h_new = (1.0 - z) * n + z * h
            return h_new, h_new

        h0 = jnp.zeros((B, H), jnp.float32)
        _, seq = jax.lax.scan(step, h0, seq)
    return seq[-1] @ w_fc + b_fc


if __name__ == "__main__":
    # Small shapes consistent with the module's forward.
    B, T, D, H, O, L = 2, 8, 16, 32, 8, 2   # batch, seq, input, hidden, output, gru layers

    key = jax.random.PRNGKey(0)
    keys = jax.random.split(key, 4 * L + 3)
    bound = 1.0 / float(H) ** 0.5

    # Deterministic synthetic GRU parameters (gate order r, z, n):
    #   w_ih: (3, D_in, H), w_hh: (3, H, H), biases: (3, 1, H)
    gru_params = []
    kidx = 0
    for layer in range(L):
        d_in = D if layer == 0 else H
        w_ih = jax.random.uniform(keys[kidx], (3, d_in, H), jnp.float32, -bound, bound); kidx += 1
        w_hh = jax.random.uniform(keys[kidx], (3, H, H), jnp.float32, -bound, bound); kidx += 1
        b_ih = jax.random.uniform(keys[kidx], (3, 1, H), jnp.float32, -bound, bound); kidx += 1
        b_hh = jax.random.uniform(keys[kidx], (3, 1, H), jnp.float32, -bound, bound); kidx += 1
        gru_params.append((w_ih, w_hh, b_ih, b_hh))

    # fc1: (H -> O), stored as (H, O) + (1, O)
    w_fc = jax.random.uniform(keys[kidx], (H, O), jnp.float32, -bound, bound); kidx += 1
    b_fc = jax.random.uniform(keys[kidx], (1, O), jnp.float32, -bound, bound); kidx += 1

    # Example input (B, T, D) — batch_first like the PyTorch module.
    x = jax.random.normal(keys[kidx], (B, T, D), jnp.float32)

    out = gru_model_forward(x, gru_params, w_fc, b_fc)
    out = jax.block_until_ready(out)

    ref = gru_model_reference(x, gru_params, w_fc, b_fc)
    assert out.shape == (B, O)
    assert jnp.allclose(out, ref, rtol=1e-4, atol=1e-4), "Pallas GRU mismatch vs JAX reference"

    print("KERNEL_OK")
</pallas_src>

<mosaic_0001>
module attributes {stable_mosaic.version = 11 : i64} {
  func.func @kernel(%arg0: memref<8x2x16xf32, #tpu.memory_space<vmem>>, %arg1: memref<16x96xf32, #tpu.memory_space<vmem>>, %arg2: memref<32x96xf32, #tpu.memory_space<vmem>>, %arg3: memref<1x96xf32, #tpu.memory_space<vmem>>, %arg4: memref<1x32xf32, #tpu.memory_space<vmem>>, %arg5: memref<32x96xf32, #tpu.memory_space<vmem>>, %arg6: memref<32x96xf32, #tpu.memory_space<vmem>>, %arg7: memref<1x96xf32, #tpu.memory_space<vmem>>, %arg8: memref<1x32xf32, #tpu.memory_space<vmem>>, %arg9: memref<32x8xf32, #tpu.memory_space<vmem>>, %arg10: memref<1x8xf32, #tpu.memory_space<vmem>>, %arg11: memref<2x8xf32, #tpu.memory_space<vmem>>, %arg12: memref<8x2x32xf32, #tpu.memory_space<vmem>>) attributes {dimension_semantics = [], scalar_prefetch = 0 : i64, scratch_operands = 1 : i64, tpu.core_type = #tpu.core_type<tc>} {
    %c0 = arith.constant 0 : index
    %c0_0 = arith.constant 0 : index
    %0 = vector.load %arg1[%c0, %c0_0] : memref<16x96xf32, #tpu.memory_space<vmem>>, vector<16x96xf32>
    %c0_1 = arith.constant 0 : index
    %c0_2 = arith.constant 0 : index
    %1 = vector.load %arg2[%c0_1, %c0_2] : memref<32x96xf32, #tpu.memory_space<vmem>>, vector<32x96xf32>
    %c0_3 = arith.constant 0 : index
    %c0_4 = arith.constant 0 : index
    %2 = vector.load %arg3[%c0_3, %c0_4] : memref<1x96xf32, #tpu.memory_space<vmem>>, vector<1x96xf32>
    %c0_5 = arith.constant 0 : index
    %c0_6 = arith.constant 0 : index
    %3 = vector.load %arg4[%c0_5, %c0_6] : memref<1x32xf32, #tpu.memory_space<vmem>>, vector<1x32xf32>
    %cst = arith.constant 0.000000e+00 : f32
    %4 = vector.broadcast %cst : f32 to vector<2x32xf32>
    %c0_i32 = arith.constant 0 : i32
    %5 = arith.index_cast %c0_i32 : i32 to index
    %c0_7 = arith.constant 0 : index
    %c0_8 = arith.constant 0 : index
    %6 = vector.load %arg0[%5, %c0_7, %c0_8] : memref<8x2x16xf32, #tpu.memory_space<vmem>>, vector<1x2x16xf32>
    %7 = vector.shape_cast %6 : vector<1x2x16xf32> to vector<2x16xf32>
    %cst_9 = arith.constant dense<0.000000e+00> : vector<2x96xf32>
    %8 = tpu.matmul %7, %0, %cst_9 {dimension_numbers = #tpu.dot_dimension_numbers<[1], [0], [0], [1], [0, 0, 1, 1], [], []>} : vector<2x16xf32>, vector<16x96xf32>, vector<2x96xf32> -> vector<2x96xf32>
    %9 = vector.broadcast %2 : vector<1x96xf32> to vector<2x96xf32>
    %10 = arith.addf %8, %9 : vector<2x96xf32>
    %cst_10 = arith.constant dense<0.000000e+00> : vector<2x96xf32>
    %11 = tpu.matmul %4, %1, %cst_10 {dimension_numbers = #tpu.dot_dimension_numbers<[1], [0], [0], [1], [0, 0, 1, 1], [], []>} : vector<2x32xf32>, vector<32x96xf32>, vector<2x96xf32> -> vector<2x96xf32>
    %12 = vector.extract_strided_slice %10 {offsets = [0, 0], sizes = [2, 32], strides = [1, 1]} : vector<2x96xf32> to vector<2x32xf32>
    %13 = vector.extract_strided_slice %11 {offsets = [0, 0], sizes = [2, 32], strides = [1, 1]} : vector<2x96xf32> to vector<2x32xf32>
    %14 = arith.addf %12, %13 : vector<2x32xf32>
    %15 = arith.negf %14 : vector<2x32xf32>
    %16 = math.exp %15 : vector<2x32xf32>
    %cst_11 = arith.constant 1.000000e+00 : f32
    %17 = vector.broadcast %cst_11 : f32 to vector<2x32xf32>
    %18 = arith.addf %17, %16 : vector<2x32xf32>
    %19 = arith.divf %17, %18 : vector<2x32xf32>
    %20 = vector.extract_strided_slice %10 {offsets = [0, 32], sizes = [2, 32], strides = [1, 1]} : vector<2x96xf32> to vector<2x32xf32>
    %21 = vector.extract_strided_slice %11 {offsets = [0, 32], sizes = [2, 32], strides = [1, 1]} : vector<2x96xf32> to vector<2x32xf32>
    %22 = arith.addf %20, %21 : vector<2x32xf32>
    %23 = arith.negf %22 : vector<2x32xf32>
    %24 = math.exp %23 : vector<2x32xf32>
    %cst_12 = arith.constant 1.000000e+00 : f32
    %25 = vector.broadcast %cst_12 : f32 to vector<2x32xf32>
    %26 = arith.addf %25, %24 : vector<2x32xf32>
    %27 = arith.divf %25, %26 : vector<2x32xf32>
    %28 = vector.extract_strided_slice %10 {offsets = [0, 64], sizes = [2, 32], strides = [1, 1]} : vector<2x96xf32> to vector<2x32xf32>
    %29 = vector.extract_strided_slice %11 {offsets = [0, 64], sizes = [2, 32], strides = [1, 1]} : vector<2x96xf32> to vector<2x32xf32>
    %30 = vector.broadcast %3 : vector<1x32xf32> to vector<2x32xf32>
    %31 = arith.addf %29, %30 : vector<2x32xf32>
    %32 = arith.mulf %19, %31 : vector<2x32xf32>
    %33 = arith.addf %28, %32 : vector<2x32xf32>
    %34 = math.tanh %33 : vector<2x32xf32>
    %35 = arith.subf %4, %34 : vector<2x32xf32>
    %36 = arith.mulf %27, %35 : vector<2x32xf32>
    %37 = arith.addf %34, %36 : vector<2x32xf32>
    %38 = arith.index_cast %c0_i32 : i32 to index
    %c0_13 = arith.constant 0 : index
    %c0_14 = arith.constant 0 : index
    %39 = vector.load %arg12[%38, %c0_13, %c0_14] : memref<8x2x32xf32, #tpu.memory_space<vmem>>, vector<1x2x32xf32>
    %40 = vector.shape_cast %39 : vector<1x2x32xf32> to vector<2x32xf32>
    %41 = vector.shape_cast %37 : vector<2x32xf32> to vector<1x2x32xf32>
    tpu.vector_store %arg12[%38, %c0_13, %c0_14], %41 {strides = array<i32>} : memref<8x2x32xf32, #tpu.memory_space<vmem>>, vector<1x2x32xf32>,
    %c1_i32 = arith.constant 1 : i32
    %42 = arith.index_cast %c1_i32 : i32 to index
    %c0_15 = arith.constant 0 : index
    %c0_16 = arith.constant 0 : index
    %43 = vector.load %arg0[%42, %c0_15, %c0_16] : memref<8x2x16xf32, #tpu.memory_space<vmem>>, vector<1x2x16xf32>
    %44 = vector.shape_cast %43 : vector<1x2x16xf32> to vector<2x16xf32>
    %cst_17 = arith.constant dense<0.000000e+00> : vector<2x96xf32>
    %45 = tpu.matmul %44, %0, %cst_17 {dimension_numbers = #tpu.dot_dimension_numbers<[1], [0], [0], [1], [0, 0, 1, 1], [], []>} : vector<2x16xf32>, vector<16x96xf32>, vector<2x96xf32> -> vector<2x96xf32>
    %46 = vector.broadcast %2 : vector<1x96xf32> to vector<2x96xf32>
    %47 = arith.addf %45, %46 : vector<2x96xf32>
    %cst_18 = arith.constant dense<0.000000e+00> : vector<2x96xf32>
    %48 = tpu.matmul %37, %1, %cst_18 {dimension_numbers = #tpu.dot_dimension_numbers<[1], [0], [0], [1], [0, 0, 1, 1], [], []>} : vector<2x32xf32>, vector<32x96xf32>, vector<2x96xf32> -> vector<2x96xf32>
    %49 = vector.extract_strided_slice %47 {offsets = [0, 0], sizes = [2, 32], strides = [1, 1]} : vector<2x96xf32> to vector<2x32xf32>
    %50 = vector.extract_strided_slice %48 {offsets = [0, 0], sizes = [2, 32], strides = [1, 1]} : vector<2x96xf32> to vector<2x32xf32>
    %51 = arith.addf %49, %50 : vector<2x32xf32>
    %52 = arith.negf %51 : vector<2x32xf32>
    %53 = math.exp %52 : vector<2x32xf32>
    %cst_19 = arith.constant 1.000000e+00 : f32
    %54 = vector.broadcast %cst_19 : f32 to vector<2x32xf32>
    %55 = arith.addf %54, %53 : vector<2x32xf32>
    %56 = arith.divf %54, %55 : vector<2x32xf32>
    %57 = vector.extract_strided_slice %47 {offsets = [0, 32], sizes = [2, 32], strides = [1, 1]} : vector<2x96xf32> to vector<2x32xf32>
    %58 = vector.extract_strided_slice %48 {offsets = [0, 32], sizes = [2, 32], strides = [1, 1]} : vector<2x96xf32> to vector<2x32xf32>
    %59 = arith.addf %57, %58 : vector<2x32xf32>
    %60 = arith.negf %59 : vector<2x32xf32>
    %61 = math.exp %60 : vector<2x32xf32>
    %cst_20 = arith.constant 1.000000e+00 : f32
    %62 = vector.broadcast %cst_20 : f32 to vector<2x32xf32>
    %63 = arith.addf %62, %61 : vector<2x32xf32>
    %64 = arith.divf %62, %63 : vector<2x32xf32>
    %65 = vector.extract_strided_slice %47 {offsets = [0, 64], sizes = [2, 32], strides = [1, 1]} : vector<2x96xf32> to vector<2x32xf32>
    %66 = vector.extract_strided_slice %48 {offsets = [0, 64], sizes = [2, 32], strides = [1, 1]} : vector<2x96xf32> to vector<2x32xf32>
    %67 = vector.broadcast %3 : vector<1x32xf32> to vector<2x32xf32>
    %68 = arith.addf %66, %67 : vector<2x32xf32>
    %69 = arith.mulf %56, %68 : vector<2x32xf32>
    %70 = arith.addf %65, %69 : vector<2x32xf32>
    %71 = math.tanh %70 : vector<2x32xf32>
    %72 = arith.subf %37, %71 : vector<2x32xf32>
    %73 = arith.mulf %64, %72 : vector<2x32xf32>
    %74 = arith.addf %71, %73 : vector<2x32xf32>
    %75 = arith.index_cast %c1_i32 : i32 to index
    %c0_21 = arith.constant 0 : index
    %c0_22 = arith.constant 0 : index
    %76 = vector.load %arg12[%75, %c0_21, %c0_22] : memref<8x2x32xf32, #tpu.memory_space<vmem>>, vector<1x2x32xf32>
    %77 = vector.shape_cast %76 : vector<1x2x32xf32> to vector<2x32xf32>
    %78 = vector.shape_cast %74 : vector<2x32xf32> to vector<1x2x32xf32>
    tpu.vector_store %arg12[%75, %c0_21, %c0_22], %78 {strides = array<i32>} : memref<8x2x32xf32, #tpu.memory_space<vmem>>, vector<1x2x32xf32>,
    %c2_i32 = arith.constant 2 : i32
    %79 = arith.index_cast %c2_i32 : i32 to index
    %c0_23 = arith.constant 0 : index
    %c0_24 = arith.constant 0 : index
    %80 = vector.load %arg0[%79, %c0_23, %c0_24] : memref<8x2x16xf32, #tpu.memory_space<vmem>>, vector<1x2x16xf32>
    %81 = vector.shape_cast %80 : vector<1x2x16xf32> to vector<2x16xf32>
    %cst_25 = arith.constant dense<0.000000e+00> : vector<2x96xf32>
    %82 = tpu.matmul %81, %0, %cst_25 {dimension_numbers = #tpu.dot_dimension_numbers<[1], [0], [0], [1], [0, 0, 1, 1], [], []>} : vector<2x16xf32>, vector<16x96xf32>, vector<2x96xf32> -> vector<2x96xf32>
    %83 = vector.broadcast %2 : vector<1x96xf32> to vector<2x96xf32>
    %84 = arith.addf %82, %83 : vector<2x96xf32>
    %cst_26 = arith.constant dense<0.000000e+00> : vector<2x96xf32>
    %85 = tpu.matmul %74, %1, %cst_26 {dimension_numbers = #tpu.dot_dimension_numbers<[1], [0], [0], [1], [0, 0, 1, 1], [], []>} : vector<2x32xf32>, vector<32x96xf32>, vector<2x96xf32> -> vector<2x96xf32>
    %86 = vector.extract_strided_slice %84 {offsets = [0, 0], sizes = [2, 32], strides = [1, 1]} : vector<2x96xf32> to vector<2x32xf32>
    %87 = vector.extract_strided_slice %85 {offsets = [0, 0], sizes = [2, 32], strides = [1, 1]} : vector<2x96xf32> to vector<2x32xf32>
    %88 = arith.addf %86, %87 : vector<2x32xf32>
    %89 = arith.negf %88 : vector<2x32xf32>
    %90 = math.exp %89 : vector<2x32xf32>
    %cst_27 = arith.constant 1.000000e+00 : f32
    %91 = vector.broadcast %cst_27 : f32 to vector<2x32xf32>
    %92 = arith.addf %91, %90 : vector<2x32xf32>
    %93 = arith.divf %91, %92 : vector<2x32xf32>
    %94 = vector.extract_strided_slice %84 {offsets = [0, 32], sizes = [2, 32], strides = [1, 1]} : vector<2x96xf32> to vector<2x32xf32>
    %95 = vector.extract_strided_slice %85 {offsets = [0, 32], sizes = [2, 32], strides = [1, 1]} : vector<2x96xf32> to vector<2x32xf32>
    %96 = arith.addf %94, %95 : vector<2x32xf32>
    %97 = arith.negf %96 : vector<2x32xf32>
    %98 = math.exp %97 : vector<2x32xf32>
    %cst_28 = arith.constant 1.000000e+00 : f32
    %99 = vector.broadcast %cst_28 : f32 to vector<2x32xf32>
    %100 = arith.addf %99, %98 : vector<2x32xf32>
    %101 = arith.divf %99, %100 : vector<2x32xf32>
    %102 = vector.extract_strided_slice %84 {offsets = [0, 64], sizes = [2, 32], strides = [1, 1]} : vector<2x96xf32> to vector<2x32xf32>
    %103 = vector.extract_strided_slice %85 {offsets = [0, 64], sizes = [2, 32], strides = [1, 1]} : vector<2x96xf32> to vector<2x32xf32>
    %104 = vector.broadcast %3 : vector<1x32xf32> to vector<2x32xf32>
    %105 = arith.addf %103, %104 : vector<2x32xf32>
    %106 = arith.mulf %93, %105 : vector<2x32xf32>
    %107 = arith.addf %102, %106 : vector<2x32xf32>
    %108 = math.tanh %107 : vector<2x32xf32>
    %109 = arith.subf %74, %108 : vector<2x32xf32>
    %110 = arith.mulf %101, %109 : vector<2x32xf32>
    %111 = arith.addf %108, %110 : vector<2x32xf32>
    %112 = arith.index_cast %c2_i32 : i32 to index
    %c0_29 = arith.constant 0 : index
    %c0_30 = arith.constant 0 : index
    %113 = vector.load %arg12[%112, %c0_29, %c0_30] : memref<8x2x32xf32, #tpu.memory_space<vmem>>, vector<1x2x32xf32>
    %114 = vector.shape_cast %113 : vector<1x2x32xf32> to vector<2x32xf32>
    %115 = vector.shape_cast %111 : vector<2x32xf32> to vector<1x2x32xf32>
    tpu.vector_store %arg12[%112, %c0_29, %c0_30], %115 {strides = array<i32>} : memref<8x2x32xf32, #tpu.memory_space<vmem>>, vector<1x2x32xf32>,
    %c3_i32 = arith.constant 3 : i32
    %116 = arith.index_cast %c3_i32 : i32 to index
    %c0_31 = arith.constant 0 : index
    %c0_32 = arith.constant 0 : index
    %117 = vector.load %arg0[%116, %c0_31, %c0_32] : memref<8x2x16xf32, #tpu.memory_space<vmem>>, vector<1x2x16xf32>
    %118 = vector.shape_cast %117 : vector<1x2x16xf32> to vector<2x16xf32>
    %cst_33 = arith.constant dense<0.000000e+00> : vector<2x96xf32>
    %119 = tpu.matmul %118, %0, %cst_33 {dimension_numbers = #tpu.dot_dimension_numbers<[1], [0], [0], [1], [0, 0, 1, 1], [], []>} : vector<2x16xf32>, vector<16x96xf32>, vector<2x96xf32> -> vector<2x96xf32>
    %120 = vector.broadcast %2 : vector<1x96xf32> to vector<2x96xf32>
    %121 = arith.addf %119, %120 : vector<2x96xf32>
    %cst_34 = arith.constant dense<0.000000e+00> : vector<2x96xf32>
    %122 = tpu.matmul %111, %1, %cst_34 {dimension_numbers = #tpu.dot_dimension_numbers<[1], [0], [0], [1], [0, 0, 1, 1], [], []>} : vector<2x32xf32>, vector<32x96xf32>, vector<2x96xf32> -> vector<2x96xf32>
    %123 = vector.extract_strided_slice %121 {offsets = [0, 0], sizes = [2, 32], strides = [1, 1]} : vector<2x96xf32> to vector<2x32xf32>
    %124 = vector.extract_strided_slice %122 {offsets = [0, 0], sizes = [2, 32], strides = [1, 1]} : vector<2x96xf32> to vector<2x32xf32>
    %125 = arith.addf %123, %124 : vector<2x32xf32>
    %126 = arith.negf %125 : vector<2x32xf32>
    %127 = math.exp %126 : vector<2x32xf32>
    %cst_35 = arith.constant 1.000000e+00 : f32
    %128 = vector.broadcast %cst_35 : f32 to vector<2x32xf32>
    %129 = arith.addf %128, %127 : vector<2x32xf32>
    %130 = arith.divf %128, %129 : vector<2x32xf32>
    %131 = vector.extract_strided_slice %121 {offsets = [0, 32], sizes = [2, 32], strides = [1, 1]} : vector<2x96xf32> to vector<2x32xf32>
    %132 = vector.extract_strided_slice %122 {offsets = [0, 32], sizes = [2, 32], strides = [1, 1]} : vector<2x96xf32> to vector<2x32xf32>
    %133 = arith.addf %131, %132 : vector<2x32xf32>
    %134 = arith.negf %133 : vector<2x32xf32>
    %135 = math.exp %134 : vector<2x32xf32>
    %cst_36 = arith.constant 1.000000e+00 : f32
    %136 = vector.broadcast %cst_36 : f32 to vector<2x32xf32>
    %137 = arith.addf %136, %135 : vector<2x32xf32>
    %138 = arith.divf %136, %137 : vector<2x32xf32>
    %139 = vector.extract_strided_slice %121 {offsets = [0, 64], sizes = [2, 32], strides = [1, 1]} : vector<2x96xf32> to vector<2x32xf32>
    %140 = vector.extract_strided_slice %122 {offsets = [0, 64], sizes = [2, 32], strides = [1, 1]} : vector<2x96xf32> to vector<2x32xf32>
    %141 = vector.broadcast %3 : vector<1x32xf32> to vector<2x32xf32>
    %142 = arith.addf %140, %141 : vector<2x32xf32>
    %143 = arith.mulf %130, %142 : vector<2x32xf32>
    %144 = arith.addf %139, %143 : vector<2x32xf32>
    %145 = math.tanh %144 : vector<2x32xf32>
    %146 = arith.subf %111, %145 : vector<2x32xf32>
    %147 = arith.mulf %138, %146 : vector<2x32xf32>
    %148 = arith.addf %145, %147 : vector<2x32xf32>
    %149 = arith.index_cast %c3_i32 : i32 to index
    %c0_37 = arith.constant 0 : index
    %c0_38 = arith.constant 0 : index
    %150 = vector.load %arg12[%149, %c0_37, %c0_38] : memref<8x2x32xf32, #tpu.memory_space<vmem>>, vector<1x2x32xf32>
    %151 = vector.shape_cast %150 : vector<1x2x32xf32> to vector<2x32xf32>
    %152 = vector.shape_cast %148 : vector<2x32xf32> to vector<1x2x32xf32>
    tpu.vector_store %arg12[%149, %c0_37, %c0_38], %152 {strides = array<i32>} : memref<8x2x32xf32, #tpu.memory_space<vmem>>, vector<1x2x32xf32>,
    %c4_i32 = arith.constant 4 : i32
    %153 = arith.index_cast %c4_i32 : i32 to index
    %c0_39 = arith.constant 0 : index
    %c0_40 = arith.constant 0 : index
    %154 = vector.load %arg0[%153, %c0_39, %c0_40] : memref<8x2x16xf32, #tpu.memory_space<vmem>>, vector<1x2x16xf32>
    %155 = vector.shape_cast %154 : vector<1x2x16xf32> to vector<2x16xf32>
    %cst_41 = arith.constant dense<0.000000e+00> : vector<2x96xf32>
    %156 = tpu.matmul %155, %0, %cst_41 {dimension_numbers = #tpu.dot_dimension_numbers<[1], [0], [0], [1], [0, 0, 1, 1], [], []>} : vector<2x16xf32>, vector<16x96xf32>, vector<2x96xf32> -> vector<2x96xf32>
    %157 = vector.broadcast %2 : vector<1x96xf32> to vector<2x96xf32>
    %158 = arith.addf %156, %157 : vector<2x96xf32>
    %cst_42 = arith.constant dense<0.000000e+00> : vector<2x96xf32>
    %159 = tpu.matmul %148, %1, %cst_42 {dimension_numbers = #tpu.dot_dimension_numbers<[1], [0], [0], [1], [0, 0, 1, 1], [], []>} : vector<2x32xf32>, vector<32x96xf32>, vector<2x96xf32> -> vector<2x96xf32>
    %160 = vector.extract_strided_slice %158 {offsets = [0, 0], sizes = [2, 32], strides = [1, 1]} : vector<2x96xf32> to vector<2x32xf32>
    %161 = vector.extract_strided_slice %159 {offsets = [0, 0], sizes = [2, 32], strides = [1, 1]} : vector<2x96xf32> to vector<2x32xf32>
    %162 = arith.addf %160, %161 : vector<2x32xf32>
    %163 = arith.negf %162 : vector<2x32xf32>
    %164 = math.exp %163 : vector<2x32xf32>
    %cst_43 = arith.constant 1.000000e+00 : f32
    %165 = vector.broadcast %cst_43 : f32 to vector<2x32xf32>
    %166 = arith.addf %165, %164 : vector<2x32xf32>
    %167 = arith.divf %165, %166 : vector<2x32xf32>
    %168 = vector.extract_strided_slice %158 {offsets = [0, 32], sizes = [2, 32], strides = [1, 1]} : vector<2x96xf32> to vector<2x32xf32>
    %169 = vector.extract_strided_slice %159 {offsets = [0, 32], sizes = [2, 32], strides = [1, 1]} : vector<2x96xf32> to vector<2x32xf32>
    %170 = arith.addf %168, %169 : vector<2x32xf32>
    %171 = arith.negf %170 : vector<2x32xf32>
    %172 = math.exp %171 : vector<2x32xf32>
    %cst_44 = arith.constant 1.000000e+00 : f32
    %173 = vector.broadcast %cst_44 : f32 to vector<2x32xf32>
    %174 = arith.addf %173, %172 : vector<2x32xf32>
    %175 = arith.divf %173, %174 : vector<2x32xf32>
    %176 = vector.extract_strided_slice %158 {offsets = [0, 64], sizes = [2, 32], strides = [1, 1]} : vector<2x96xf32> to vector<2x32xf32>
    %177 = vector.extract_strided_slice %159 {offsets = [0, 64], sizes = [2, 32], strides = [1, 1]} : vector<2x96xf32> to vector<2x32xf32>
    %178 = vector.broadcast %3 : vector<1x32xf32> to vector<2x32xf32>
    %179 = arith.addf %177, %178 : vector<2x32xf32>
    %180 = arith.mulf %167, %179 : vector<2x32xf32>
    %181 = arith.addf %176, %180 : vector<2x32xf32>
    %182 = math.tanh %181 : vector<2x32xf32>
    %183 = arith.subf %148, %182 : vector<2x32xf32>
    %184 = arith.mulf %175, %183 : vector<2x32xf32>
    %185 = arith.addf %182, %184 : vector<2x32xf32>
    %186 = arith.index_cast %c4_i32 : i32 to index
    %c0_45 = arith.constant 0 : index
    %c0_46 = arith.constant 0 : index
    %187 = vector.load %arg12[%186, %c0_45, %c0_46] : memref<8x2x32xf32, #tpu.memory_space<vmem>>, vector<1x2x32xf32>
    %188 = vector.shape_cast %187 : vector<1x2x32xf32> to vector<2x32xf32>
    %189 = vector.shape_cast %185 : vector<2x32xf32> to vector<1x2x32xf32>
    tpu.vector_store %arg12[%186, %c0_45, %c0_46], %189 {strides = array<i32>} : memref<8x2x32xf32, #tpu.memory_space<vmem>>, vector<1x2x32xf32>,
    %c5_i32 = arith.constant 5 : i32
    %190 = arith.index_cast %c5_i32 : i32 to index
    %c0_47 = arith.constant 0 : index
    %c0_48 = arith.constant 0 : index
    %191 = vector.load %arg0[%190, %c0_47, %c0_48] : memref<8x2x16xf32, #tpu.memory_space<vmem>>, vector<1x2x16xf32>
    %192 = vector.shape_cast %191 : vector<1x2x16xf32> to vector<2x16xf32>
    %cst_49 = arith.constant dense<0.000000e+00> : vector<2x96xf32>
    %193 = tpu.matmul %192, %0, %cst_49 {dimension_numbers = #tpu.dot_dimension_numbers<[1], [0], [0], [1], [0, 0, 1, 1], [], []>} : vector<2x16xf32>, vector<16x96xf32>, vector<2x96xf32> -> vector<2x96xf32>
    %194 = vector.broadcast %2 : vector<1x96xf32> to vector<2x96xf32>
    %195 = arith.addf %193, %194 : vector<2x96xf32>
    %cst_50 = arith.constant dense<0.000000e+00> : vector<2x96xf32>
    %196 = tpu.matmul %185, %1, %cst_50 {dimension_numbers = #tpu.dot_dimension_numbers<[1], [0], [0], [1], [0, 0, 1, 1], [], []>} : vector<2x32xf32>, vector<32x96xf32>, vector<2x96xf32> -> vector<2x96xf32>
    %197 = vector.extract_strided_slice %195 {offsets = [0, 0], sizes = [2, 32], strides = [1, 1]} : vector<2x96xf32> to vector<2x32xf32>
    %198 = vector.extract_strided_slice %196 {offsets = [0, 0], sizes = [2, 32], strides = [1, 1]} : vector<2x96xf32> to vector<2x32xf32>
    %199 = arith.addf %197, %198 : vector<2x32xf32>
    %200 = arith.negf %199 : vector<2x32xf32>
    %201 = math.exp %200 : vector<2x32xf32>
    %cst_51 = arith.constant 1.000000e+00 : f32
    %202 = vector.broadcast %cst_51 : f32 to vector<2x32xf32>
    %203 = arith.addf %202, %201 : vector<2x32xf32>
    %204 = arith.divf %202, %203 : vector<2x32xf32>
    %205 = vector.extract_strided_slice %195 {offsets = [0, 32], sizes = [2, 32], strides = [1, 1]} : vector<2x96xf32> to vector<2x32xf32>
    %206 = vector.extract_strided_slice %196 {offsets = [0, 32], sizes = [2, 32], strides = [1, 1]} : vector<2x96xf32> to vector<2x32xf32>
    %207 = arith.addf %205, %206 : vector<2x32xf32>
    %208 = arith.negf %207 : vector<2x32xf32>
    %209 = math.exp %208 : vector<2x32xf32>
    %cst_52 = arith.constant 1.000000e+00 : f32
    %210 = vector.broadcast %cst_52 : f32 to vector<2x32xf32>
    %211 = arith.addf %210, %209 : vector<2x32xf32>
    %212 = arith.divf %210, %211 : vector<2x32xf32>
    %213 = vector.extract_strided_slice %195 {offsets = [0, 64], sizes = [2, 32], strides = [1, 1]} : vector<2x96xf32> to vector<2x32xf32>
    %214 = vector.extract_strided_slice %196 {offsets = [0, 64], sizes = [2, 32], strides = [1, 1]} : vector<2x96xf32> to vector<2x32xf32>
    %215 = vector.broadcast %3 : vector<1x32xf32> to vector<2x32xf32>
    %216 = arith.addf %214, %215 : vector<2x32xf32>
    %217 = arith.mulf %204, %216 : vector<2x32xf32>
    %218 = arith.addf %213, %217 : vector<2x32xf32>
    %219 = math.tanh %218 : vector<2x32xf32>
    %220 = arith.subf %185, %219 : vector<2x32xf32>
    %221 = arith.mulf %212, %220 : vector<2x32xf32>
    %222 = arith.addf %219, %221 : vector<2x32xf32>
    %223 = arith.index_cast %c5_i32 : i32 to index
    %c0_53 = arith.constant 0 : index
    %c0_54 = arith.constant 0 : index
    %224 = vector.load %arg12[%223, %c0_53, %c0_54] : memref<8x2x32xf32, #tpu.memory_space<vmem>>, vector<1x2x32xf32>
    %225 = vector.shape_cast %224 : vector<1x2x32xf32> to vector<2x32xf32>
    %226 = vector.shape_cast %222 : vector<2x32xf32> to vector<1x2x32xf32>
    tpu.vector_store %arg12[%223, %c0_53, %c0_54], %226 {strides = array<i32>} : memref<8x2x32xf32, #tpu.memory_space<vmem>>, vector<1x2x32xf32>,
    %c6_i32 = arith.constant 6 : i32
    %227 = arith.index_cast %c6_i32 : i32 to index
    %c0_55 = arith.constant 0 : index
    %c0_56 = arith.constant 0 : index
    %228 = vector.load %arg0[%227, %c0_55, %c0_56] : memref<8x2x16xf32, #tpu.memory_space<vmem>>, vector<1x2x16xf32>
    %229 = vector.shape_cast %228 : vector<1x2x16xf32> to vector<2x16xf32>
    %cst_57 = arith.constant dense<0.000000e+00> : vector<2x96xf32>
    %230 = tpu.matmul %229, %0, %cst_57 {dimension_numbers = #tpu.dot_dimension_numbers<[1], [0], [0], [1], [0, 0, 1, 1], [], []>} : vector<2x16xf32>, vector<16x96xf32>, vector<2x96xf32> -> vector<2x96xf32>
    %231 = vector.broadcast %2 : vector<1x96xf32> to vector<2x96xf32>
    %232 = arith.addf %230, %231 : vector<2x96xf32>
    %cst_58 = arith.constant dense<0.000000e+00> : vector<2x96xf32>
    %233 = tpu.matmul %222, %1, %cst_58 {dimension_numbers = #tpu.dot_dimension_numbers<[1], [0], [0], [1], [0, 0, 1, 1], [], []>} : vector<2x32xf32>, vector<32x96xf32>, vector<2x96xf32> -> vector<2x96xf32>
    %234 = vector.extract_strided_slice %232 {offsets = [0, 0], sizes = [2, 32], strides = [1, 1]} : vector<2x96xf32> to vector<2x32xf32>
    %235 = vector.extract_strided_slice %233 {offsets = [0, 0], sizes = [2, 32], strides = [1, 1]} : vector<2x96xf32> to vector<2x32xf32>
    %236 = arith.addf %234, %235 : vector<2x32xf32>
    %237 = arith.negf %236 : vector<2x32xf32>
    %238 = math.exp %237 : vector<2x32xf32>
    %cst_59 = arith.constant 1.000000e+00 : f32
    %239 = vector.broadcast %cst_59 : f32 to vector<2x32xf32>
    %240 = arith.addf %239, %238 : vector<2x32xf32>
    %241 = arith.divf %239, %240 : vector<2x32xf32>
    %242 = vector.extract_strided_slice %232 {offsets = [0, 32], sizes = [2, 32], strides = [1, 1]} : vector<2x96xf32> to vector<2x32xf32>
    %243 = vector.extract_strided_slice %233 {offsets = [0, 32], sizes = [2, 32], strides = [1, 1]} : vector<2x96xf32> to vector<2x32xf32>
    %244 = arith.addf %242, %243 : vector<2x32xf32>
    %245 = arith.negf %244 : vector<2x32xf32>
    %246 = math.exp %245 : vector<2x32xf32>
    %cst_60 = arith.constant 1.000000e+00 : f32
    %247 = vector.broadcast %cst_60 : f32 to vector<2x32xf32>
    %248 = arith.addf %247, %246 : vector<2x32xf32>
    %249 = arith.divf %247, %248 : vector<2x32xf32>
    %250 = vector.extract_strided_slice %232 {offsets = [0, 64], sizes = [2, 32], strides = [1, 1]} : vector<2x96xf32> to vector<2x32xf32>
    %251 = vector.extract_strided_slice %233 {offsets = [0, 64], sizes = [2, 32], strides = [1, 1]} : vector<2x96xf32> to vector<2x32xf32>
    %252 = vector.broadcast %3 : vector<1x32xf32> to vector<2x32xf32>
    %253 = arith.addf %251, %252 : vector<2x32xf32>
    %254 = arith.mulf %241, %253 : vector<2x32xf32>
    %255 = arith.addf %250, %254 : vector<2x32xf32>
    %256 = math.tanh %255 : vector<2x32xf32>
    %257 = arith.subf %222, %256 : vector<2x32xf32>
    %258 = arith.mulf %249, %257 : vector<2x32xf32>
    %259 = arith.addf %256, %258 : vector<2x32xf32>
    %260 = arith.index_cast %c6_i32 : i32 to index
    %c0_61 = arith.constant 0 : index
    %c0_62 = arith.constant 0 : index
    %261 = vector.load %arg12[%260, %c0_61, %c0_62] : memref<8x2x32xf32, #tpu.memory_space<vmem>>, vector<1x2x32xf32>
    %262 = vector.shape_cast %261 : vector<1x2x32xf32> to vector<2x32xf32>
    %263 = vector.shape_cast %259 : vector<2x32xf32> to vector<1x2x32xf32>
    tpu.vector_store %arg12[%260, %c0_61, %c0_62], %263 {strides = array<i32>} : memref<8x2x32xf32, #tpu.memory_space<vmem>>, vector<1x2x32xf32>,
    %c7_i32 = arith.constant 7 : i32
    %264 = arith.index_cast %c7_i32 : i32 to index
    %c0_63 = arith.constant 0 : index
    %c0_64 = arith.constant 0 : index
    %265 = vector.load %arg0[%264, %c0_63, %c0_64] : memref<8x2x16xf32, #tpu.memory_space<vmem>>, vector<1x2x16xf32>
    %266 = vector.shape_cast %265 : vector<1x2x16xf32> to vector<2x16xf32>
    %cst_65 = arith.constant dense<0.000000e+00> : vector<2x96xf32>
    %267 = tpu.matmul %266, %0, %cst_65 {dimension_numbers = #tpu.dot_dimension_numbers<[1], [0], [0], [1], [0, 0, 1, 1], [], []>} : vector<2x16xf32>, vector<16x96xf32>, vector<2x96xf32> -> vector<2x96xf32>
    %268 = vector.broadcast %2 : vector<1x96xf32> to vector<2x96xf32>
    %269 = arith.addf %267, %268 : vector<2x96xf32>
    %cst_66 = arith.constant dense<0.000000e+00> : vector<2x96xf32>
    %270 = tpu.matmul %259, %1, %cst_66 {dimension_numbers = #tpu.dot_dimension_numbers<[1], [0], [0], [1], [0, 0, 1, 1], [], []>} : vector<2x32xf32>, vector<32x96xf32>, vector<2x96xf32> -> vector<2x96xf32>
    %271 = vector.extract_strided_slice %269 {offsets = [0, 0], sizes = [2, 32], strides = [1, 1]} : vector<2x96xf32> to vector<2x32xf32>
    %272 = vector.extract_strided_slice %270 {offsets = [0, 0], sizes = [2, 32], strides = [1, 1]} : vector<2x96xf32> to vector<2x32xf32>
    %273 = arith.addf %271, %272 : vector<2x32xf32>
    %274 = arith.negf %273 : vector<2x32xf32>
    %275 = math.exp %274 : vector<2x32xf32>
    %cst_67 = arith.constant 1.000000e+00 : f32
    %276 = vector.broadcast %cst_67 : f32 to vector<2x32xf32>
    %277 = arith.addf %276, %275 : vector<2x32xf32>
    %278 = arith.divf %276, %277 : vector<2x32xf32>
    %279 = vector.extract_strided_slice %269 {offsets = [0, 32], sizes = [2, 32], strides = [1, 1]} : vector<2x96xf32> to vector<2x32xf32>
    %280 = vector.extract_strided_slice %270 {offsets = [0, 32], sizes = [2, 32], strides = [1, 1]} : vector<2x96xf32> to vector<2x32xf32>
    %281 = arith.addf %279, %280 : vector<2x32xf32>
    %282 = arith.negf %281 : vector<2x32xf32>
    %283 = math.exp %282 : vector<2x32xf32>
    %cst_68 = arith.constant 1.000000e+00 : f32
    %284 = vector.broadcast %cst_68 : f32 to vector<2x32xf32>
    %285 = arith.addf %284, %283 : vector<2x32xf32>
    %286 = arith.divf %284, %285 : vector<2x32xf32>
    %287 = vector.extract_strided_slice %269 {offsets = [0, 64], sizes = [2, 32], strides = [1, 1]} : vector<2x96xf32> to vector<2x32xf32>
    %288 = vector.extract_strided_slice %270 {offsets = [0, 64], sizes = [2, 32], strides = [1, 1]} : vector<2x96xf32> to vector<2x32xf32>
    %289 = vector.broadcast %3 : vector<1x32xf32> to vector<2x32xf32>
    %290 = arith.addf %288, %289 : vector<2x32xf32>
    %291 = arith.mulf %278, %290 : vector<2x32xf32>
    %292 = arith.addf %287, %291 : vector<2x32xf32>
    %293 = math.tanh %292 : vector<2x32xf32>
    %294 = arith.subf %259, %293 : vector<2x32xf32>
    %295 = arith.mulf %286, %294 : vector<2x32xf32>
    %296 = arith.addf %293, %295 : vector<2x32xf32>
    %297 = arith.index_cast %c7_i32 : i32 to index
    %c0_69 = arith.constant 0 : index
    %c0_70 = arith.constant 0 : index
    %298 = vector.load %arg12[%297, %c0_69, %c0_70] : memref<8x2x32xf32, #tpu.memory_space<vmem>>, vector<1x2x32xf32>
    %299 = vector.shape_cast %298 : vector<1x2x32xf32> to vector<2x32xf32>
    %300 = vector.shape_cast %296 : vector<2x32xf32> to vector<1x2x32xf32>
    tpu.vector_store %arg12[%297, %c0_69, %c0_70], %300 {strides = array<i32>} : memref<8x2x32xf32, #tpu.memory_space<vmem>>, vector<1x2x32xf32>,
    %c8_i32 = arith.constant 8 : i32
    %c0_71 = arith.constant 0 : index
    %c0_72 = arith.constant 0 : index
    %301 = vector.load %arg5[%c0_71, %c0_72] : memref<32x96xf32, #tpu.memory_space<vmem>>, vector<32x96xf32>
    %c0_73 = arith.constant 0 : index
    %c0_74 = arith.constant 0 : index
    %302 = vector.load %arg6[%c0_73, %c0_74] : memref<32x96xf32, #tpu.memory_space<vmem>>, vector<32x96xf32>
    %c0_75 = arith.constant 0 : index
    %c0_76 = arith.constant 0 : index
    %303 = vector.load %arg7[%c0_75, %c0_76] : memref<1x96xf32, #tpu.memory_space<vmem>>, vector<1x96xf32>
    %c0_77 = arith.constant 0 : index
    %c0_78 = arith.constant 0 : index
    %304 = vector.load %arg8[%c0_77, %c0_78] : memref<1x32xf32, #tpu.memory_space<vmem>>, vector<1x32xf32>
    %cst_79 = arith.constant 0.000000e+00 : f32
    %305 = vector.broadcast %cst_79 : f32 to vector<2x32xf32>
    %c0_i32_80 = arith.constant 0 : i32
    %306 = arith.index_cast %c0_i32_80 : i32 to index
    %c0_81 = arith.constant 0 : index
    %c0_82 = arith.constant 0 : index
    %307 = vector.load %arg12[%306, %c0_81, %c0_82] : memref<8x2x32xf32, #tpu.memory_space<vmem>>, vector<1x2x32xf32>
    %308 = vector.shape_cast %307 : vector<1x2x32xf32> to vector<2x32xf32>
    %cst_83 = arith.constant dense<0.000000e+00> : vector<2x96xf32>
    %309 = tpu.matmul %308, %301, %cst_83 {dimension_numbers = #tpu.dot_dimension_numbers<[1], [0], [0], [1], [0, 0, 1, 1], [], []>} : vector<2x32xf32>, vector<32x96xf32>, vector<2x96xf32> -> vector<2x96xf32>
    %310 = vector.broadcast %303 : vector<1x96xf32> to vector<2x96xf32>
    %311 = arith.addf %309, %310 : vector<2x96xf32>
    %cst_84 = arith.constant dense<0.000000e+00> : vector<2x96xf32>
    %312 = tpu.matmul %305, %302, %cst_84 {dimension_numbers = #tpu.dot_dimension_numbers<[1], [0], [0], [1], [0, 0, 1, 1], [], []>} : vector<2x32xf32>, vector<32x96xf32>, vector<2x96xf32> -> vector<2x96xf32>
    %313 = vector.extract_strided_slice %311 {offsets = [0, 0], sizes = [2, 32], strides = [1, 1]} : vector<2x96xf32> to vector<2x32xf32>
    %314 = vector.extract_strided_slice %312 {offsets = [0, 0], sizes = [2, 32], strides = [1, 1]} : vector<2x96xf32> to vector<2x32xf32>
    %315 = arith.addf %313, %314 : vector<2x32xf32>
    %316 = arith.negf %315 : vector<2x32xf32>
    %317 = math.exp %316 : vector<2x32xf32>
    %cst_85 = arith.constant 1.000000e+00 : f32
    %318 = vector.broadcast %cst_85 : f32 to vector<2x32xf32>
    %319 = arith.addf %318, %317 : vector<2x32xf32>
    %320 = arith.divf %318, %319 : vector<2x32xf32>
    %321 = vector.extract_strided_slice %311 {offsets = [0, 32], sizes = [2, 32], strides = [1, 1]} : vector<2x96xf32> to vector<2x32xf32>
    %322 = vector.extract_strided_slice %312 {offsets = [0, 32], sizes = [2, 32], strides = [1, 1]} : vector<2x96xf32> to vector<2x32xf32>
    %323 = arith.addf %321, %322 : vector<2x32xf32>
    %324 = arith.negf %323 : vector<2x32xf32>
    %325 = math.exp %324 : vector<2x32xf32>
    %cst_86 = arith.constant 1.000000e+00 : f32
    %326 = vector.broadcast %cst_86 : f32 to vector<2x32xf32>
    %327 = arith.addf %326, %325 : vector<2x32xf32>
    %328 = arith.divf %326, %327 : vector<2x32xf32>
    %329 = vector.extract_strided_slice %311 {offsets = [0, 64], sizes = [2, 32], strides = [1, 1]} : vector<2x96xf32> to vector<2x32xf32>
    %330 = vector.extract_strided_slice %312 {offsets = [0, 64], sizes = [2, 32], strides = [1, 1]} : vector<2x96xf32> to vector<2x32xf32>
    %331 = vector.broadcast %304 : vector<1x32xf32> to vector<2x32xf32>
    %332 = arith.addf %330, %331 : vector<2x32xf32>
    %333 = arith.mulf %320, %332 : vector<2x32xf32>
    %334 = arith.addf %329, %333 : vector<2x32xf32>
    %335 = math.tanh %334 : vector<2x32xf32>
    %336 = arith.subf %305, %335 : vector<2x32xf32>
    %337 = arith.mulf %328, %336 : vector<2x32xf32>
    %338 = arith.addf %335, %337 : vector<2x32xf32>
    %c1_i32_87 = arith.constant 1 : i32
    %339 = arith.index_cast %c1_i32_87 : i32 to index
    %c0_88 = arith.constant 0 : index
    %c0_89 = arith.constant 0 : index
    %340 = vector.load %arg12[%339, %c0_88, %c0_89] : memref<8x2x32xf32, #tpu.memory_space<vmem>>, vector<1x2x32xf32>
    %341 = vector.shape_cast %340 : vector<1x2x32xf32> to vector<2x32xf32>
    %cst_90 = arith.constant dense<0.000000e+00> : vector<2x96xf32>
    %342 = tpu.matmul %341, %301, %cst_90 {dimension_numbers = #tpu.dot_dimension_numbers<[1], [0], [0], [1], [0, 0, 1, 1], [], []>} : vector<2x32xf32>, vector<32x96xf32>, vector<2x96xf32> -> vector<2x96xf32>
    %343 = vector.broadcast %303 : vector<1x96xf32> to vector<2x96xf32>
    %344 = arith.addf %342, %343 : vector<2x96xf32>
    %cst_91 = arith.constant dense<0.000000e+00> : vector<2x96xf32>
    %345 = tpu.matmul %338, %302, %cst_91 {dimension_numbers = #tpu.dot_dimension_numbers<[1], [0], [0], [1], [0, 0, 1, 1], [], []>} : vector<2x32xf32>, vector<32x96xf32>, vector<2x96xf32> -> vector<2x96xf32>
    %346 = vector.extract_strided_slice %344 {offsets = [0, 0], sizes = [2, 32], strides = [1, 1]} : vector<2x96xf32> to vector<2x32xf32>
    %347 = vector.extract_strided_slice %345 {offsets = [0, 0], sizes = [2, 32], strides = [1, 1]} : vector<2x96xf32> to vector<2x32xf32>
    %348 = arith.addf %346, %347 : vector<2x32xf32>
    %349 = arith.negf %348 : vector<2x32xf32>
    %350 = math.exp %349 : vector<2x32xf32>
    %cst_92 = arith.constant 1.000000e+00 : f32
    %351 = vector.broadcast %cst_92 : f32 to vector<2x32xf32>
    %352 = arith.addf %351, %350 : vector<2x32xf32>
    %353 = arith.divf %351, %352 : vector<2x32xf32>
    %354 = vector.extract_strided_slice %344 {offsets = [0, 32], sizes = [2, 32], strides = [1, 1]} : vector<2x96xf32> to vector<2x32xf32>
    %355 = vector.extract_strided_slice %345 {offsets = [0, 32], sizes = [2, 32], strides = [1, 1]} : vector<2x96xf32> to vector<2x32xf32>
    %356 = arith.addf %354, %355 : vector<2x32xf32>
    %357 = arith.negf %356 : vector<2x32xf32>
    %358 = math.exp %357 : vector<2x32xf32>
    %cst_93 = arith.constant 1.000000e+00 : f32
    %359 = vector.broadcast %cst_93 : f32 to vector<2x32xf32>
    %360 = arith.addf %359, %358 : vector<2x32xf32>
    %361 = arith.divf %359, %360 : vector<2x32xf32>
    %362 = vector.extract_strided_slice %344 {offsets = [0, 64], sizes = [2, 32], strides = [1, 1]} : vector<2x96xf32> to vector<2x32xf32>
    %363 = vector.extract_strided_slice %345 {offsets = [0, 64], sizes = [2, 32], strides = [1, 1]} : vector<2x96xf32> to vector<2x32xf32>
    %364 = vector.broadcast %304 : vector<1x32xf32> to vector<2x32xf32>
    %365 = arith.addf %363, %364 : vector<2x32xf32>
    %366 = arith.mulf %353, %365 : vector<2x32xf32>
    %367 = arith.addf %362, %366 : vector<2x32xf32>
    %368 = math.tanh %367 : vector<2x32xf32>
    %369 = arith.subf %338, %368 : vector<2x32xf32>
    %370 = arith.mulf %361, %369 : vector<2x32xf32>
    %371 = arith.addf %368, %370 : vector<2x32xf32>
    %c2_i32_94 = arith.constant 2 : i32
    %372 = arith.index_cast %c2_i32_94 : i32 to index
    %c0_95 = arith.constant 0 : index
    %c0_96 = arith.constant 0 : index
    %373 = vector.load %arg12[%372, %c0_95, %c0_96] : memref<8x2x32xf32, #tpu.memory_space<vmem>>, vector<1x2x32xf32>
    %374 = vector.shape_cast %373 : vector<1x2x32xf32> to vector<2x32xf32>
    %cst_97 = arith.constant dense<0.000000e+00> : vector<2x96xf32>
    %375 = tpu.matmul %374, %301, %cst_97 {dimension_numbers = #tpu.dot_dimension_numbers<[1], [0], [0], [1], [0, 0, 1, 1], [], []>} : vector<2x32xf32>, vector<32x96xf32>, vector<2x96xf32> -> vector<2x96xf32>
    %376 = vector.broadcast %303 : vector<1x96xf32> to vector<2x96xf32>
    %377 = arith.addf %375, %376 : vector<2x96xf32>
    %cst_98 = arith.constant dense<0.000000e+00> : vector<2x96xf32>
    %378 = tpu.matmul %371, %302, %cst_98 {dimension_numbers = #tpu.dot_dimension_numbers<[1], [0], [0], [1], [0, 0, 1, 1], [], []>} : vector<2x32xf32>, vector<32x96xf32>, vector<2x96xf32> -> vector<2x96xf32>
    %379 = vector.extract_strided_slice %377 {offsets = [0, 0], sizes = [2, 32], strides = [1, 1]} : vector<2x96xf32> to vector<2x32xf32>
    %380 = vector.extract_strided_slice %378 {offsets = [0, 0], sizes = [2, 32], strides = [1, 1]} : vector<2x96xf32> to vector<2x32xf32>
    %381 = arith.addf %379, %380 : vector<2x32xf32>
    %382 = arith.negf %381 : vector<2x32xf32>
    %383 = math.exp %382 : vector<2x32xf32>
    %cst_99 = arith.constant 1.000000e+00 : f32
    %384 = vector.broadcast %cst_99 : f32 to vector<2x32xf32>
    %385 = arith.addf %384, %383 : vector<2x32xf32>
    %386 = arith.divf %384, %385 : vector<2x32xf32>
    %387 = vector.extract_strided_slice %377 {offsets = [0, 32], sizes = [2, 32], strides = [1, 1]} : vector<2x96xf32> to vector<2x32xf32>
    %388 = vector.extract_strided_slice %378 {offsets = [0, 32], sizes = [2, 32], strides = [1, 1]} : vector<2x96xf32> to vector<2x32xf32>
    %389 = arith.addf %387, %388 : vector<2x32xf32>
    %390 = arith.negf %389 : vector<2x32xf32>
    %391 = math.exp %390 : vector<2x32xf32>
    %cst_100 = arith.constant 1.000000e+00 : f32
    %392 = vector.broadcast %cst_100 : f32 to vector<2x32xf32>
    %393 = arith.addf %392, %391 : vector<2x32xf32>
    %394 = arith.divf %392, %393 : vector<2x32xf32>
    %395 = vector.extract_strided_slice %377 {offsets = [0, 64], sizes = [2, 32], strides = [1, 1]} : vector<2x96xf32> to vector<2x32xf32>
    %396 = vector.extract_strided_slice %378 {offsets = [0, 64], sizes = [2, 32], strides = [1, 1]} : vector<2x96xf32> to vector<2x32xf32>
    %397 = vector.broadcast %304 : vector<1x32xf32> to vector<2x32xf32>
    %398 = arith.addf %396, %397 : vector<2x32xf32>
    %399 = arith.mulf %386, %398 : vector<2x32xf32>
    %400 = arith.addf %395, %399 : vector<2x32xf32>
    %401 = math.tanh %400 : vector<2x32xf32>
    %402 = arith.subf %371, %401 : vector<2x32xf32>
    %403 = arith.mulf %394, %402 : vector<2x32xf32>
    %404 = arith.addf %401, %403 : vector<2x32xf32>
    %c3_i32_101 = arith.constant 3 : i32
    %405 = arith.index_cast %c3_i32_101 : i32 to index
    %c0_102 = arith.constant 0 : index
    %c0_103 = arith.constant 0 : index
    %406 = vector.load %arg12[%405, %c0_102, %c0_103] : memref<8x2x32xf32, #tpu.memory_space<vmem>>, vector<1x2x32xf32>
    %407 = vector.shape_cast %406 : vector<1x2x32xf32> to vector<2x32xf32>
    %cst_104 = arith.constant dense<0.000000e+00> : vector<2x96xf32>
    %408 = tpu.matmul %407, %301, %cst_104 {dimension_numbers = #tpu.dot_dimension_numbers<[1], [0], [0], [1], [0, 0, 1, 1], [], []>} : vector<2x32xf32>, vector<32x96xf32>, vector<2x96xf32> -> vector<2x96xf32>
    %409 = vector.broadcast %303 : vector<1x96xf32> to vector<2x96xf32>
    %410 = arith.addf %408, %409 : vector<2x96xf32>
    %cst_105 = arith.constant dense<0.000000e+00> : vector<2x96xf32>
    %411 = tpu.matmul %404, %302, %cst_105 {dimension_numbers = #tpu.dot_dimension_numbers<[1], [0], [0], [1], [0, 0, 1, 1], [], []>} : vector<2x32xf32>, vector<32x96xf32>, vector<2x96xf32> -> vector<2x96xf32>
    %412 = vector.extract_strided_slice %410 {offsets = [0, 0], sizes = [2, 32], strides = [1, 1]} : vector<2x96xf32> to vector<2x32xf32>
    %413 = vector.extract_strided_slice %411 {offsets = [0, 0], sizes = [2, 32], strides = [1, 1]} : vector<2x96xf32> to vector<2x32xf32>
    %414 = arith.addf %412, %413 : vector<2x32xf32>
    %415 = arith.negf %414 : vector<2x32xf32>
    %416 = math.exp %415 : vector<2x32xf32>
    %cst_106 = arith.constant 1.000000e+00 : f32
    %417 = vector.broadcast %cst_106 : f32 to vector<2x32xf32>
    %418 = arith.addf %417, %416 : vector<2x32xf32>
    %419 = arith.divf %417, %418 : vector<2x32xf32>
    %420 = vector.extract_strided_slice %410 {offsets = [0, 32], sizes = [2, 32], strides = [1, 1]} : vector<2x96xf32> to vector<2x32xf32>
    %421 = vector.extract_strided_slice %411 {offsets = [0, 32], sizes = [2, 32], strides = [1, 1]} : vector<2x96xf32> to vector<2x32xf32>
    %422 = arith.addf %420, %421 : vector<2x32xf32>
    %423 = arith.negf %422 : vector<2x32xf32>
    %424 = math.exp %423 : vector<2x32xf32>
    %cst_107 = arith.constant 1.000000e+00 : f32
    %425 = vector.broadcast %cst_107 : f32 to vector<2x32xf32>
    %426 = arith.addf %425, %424 : vector<2x32xf32>
    %427 = arith.divf %425, %426 : vector<2x32xf32>
    %428 = vector.extract_strided_slice %410 {offsets = [0, 64], sizes = [2, 32], strides = [1, 1]} : vector<2x96xf32> to vector<2x32xf32>
    %429 = vector.extract_strided_slice %411 {offsets = [0, 64], sizes = [2, 32], strides = [1, 1]} : vector<2x96xf32> to vector<2x32xf32>
    %430 = vector.broadcast %304 : vector<1x32xf32> to vector<2x32xf32>
    %431 = arith.addf %429, %430 : vector<2x32xf32>
    %432 = arith.mulf %419, %431 : vector<2x32xf32>
    %433 = arith.addf %428, %432 : vector<2x32xf32>
    %434 = math.tanh %433 : vector<2x32xf32>
    %435 = arith.subf %404, %434 : vector<2x32xf32>
    %436 = arith.mulf %427, %435 : vector<2x32xf32>
    %437 = arith.addf %434, %436 : vector<2x32xf32>
    %c4_i32_108 = arith.constant 4 : i32
    %438 = arith.index_cast %c4_i32_108 : i32 to index
    %c0_109 = arith.constant 0 : index
    %c0_110 = arith.constant 0 : index
    %439 = vector.load %arg12[%438, %c0_109, %c0_110] : memref<8x2x32xf32, #tpu.memory_space<vmem>>, vector<1x2x32xf32>
    %440 = vector.shape_cast %439 : vector<1x2x32xf32> to vector<2x32xf32>
    %cst_111 = arith.constant dense<0.000000e+00> : vector<2x96xf32>
    %441 = tpu.matmul %440, %301, %cst_111 {dimension_numbers = #tpu.dot_dimension_numbers<[1], [0], [0], [1], [0, 0, 1, 1], [], []>} : vector<2x32xf32>, vector<32x96xf32>, vector<2x96xf32> -> vector<2x96xf32>
    %442 = vector.broadcast %303 : vector<1x96xf32> to vector<2x96xf32>
    %443 = arith.addf %441, %442 : vector<2x96xf32>
    %cst_112 = arith.constant dense<0.000000e+00> : vector<2x96xf32>
    %444 = tpu.matmul %437, %302, %cst_112 {dimension_numbers = #tpu.dot_dimension_numbers<[1], [0], [0], [1], [0, 0, 1, 1], [], []>} : vector<2x32xf32>, vector<32x96xf32>, vector<2x96xf32> -> vector<2x96xf32>
    %445 = vector.extract_strided_slice %443 {offsets = [0, 0], sizes = [2, 32], strides = [1, 1]} : vector<2x96xf32> to vector<2x32xf32>
    %446 = vector.extract_strided_slice %444 {offsets = [0, 0], sizes = [2, 32], strides = [1, 1]} : vector<2x96xf32> to vector<2x32xf32>
    %447 = arith.addf %445, %446 : vector<2x32xf32>
    %448 = arith.negf %447 : vector<2x32xf32>
    %449 = math.exp %448 : vector<2x32xf32>
    %cst_113 = arith.constant 1.000000e+00 : f32
    %450 = vector.broadcast %cst_113 : f32 to vector<2x32xf32>
    %451 = arith.addf %450, %449 : vector<2x32xf32>
    %452 = arith.divf %450, %451 : vector<2x32xf32>
    %453 = vector.extract_strided_slice %443 {offsets = [0, 32], sizes = [2, 32], strides = [1, 1]} : vector<2x96xf32> to vector<2x32xf32>
    %454 = vector.extract_strided_slice %444 {offsets = [0, 32], sizes = [2, 32], strides = [1, 1]} : vector<2x96xf32> to vector<2x32xf32>
    %455 = arith.addf %453, %454 : vector<2x32xf32>
    %456 = arith.negf %455 : vector<2x32xf32>
    %457 = math.exp %456 : vector<2x32xf32>
    %cst_114 = arith.constant 1.000000e+00 : f32
    %458 = vector.broadcast %cst_114 : f32 to vector<2x32xf32>
    %459 = arith.addf %458, %457 : vector<2x32xf32>
    %460 = arith.divf %458, %459 : vector<2x32xf32>
    %461 = vector.extract_strided_slice %443 {offsets = [0, 64], sizes = [2, 32], strides = [1, 1]} : vector<2x96xf32> to vector<2x32xf32>
    %462 = vector.extract_strided_slice %444 {offsets = [0, 64], sizes = [2, 32], strides = [1, 1]} : vector<2x96xf32> to vector<2x32xf32>
    %463 = vector.broadcast %304 : vector<1x32xf32> to vector<2x32xf32>
    %464 = arith.addf %462, %463 : vector<2x32xf32>
    %465 = arith.mulf %452, %464 : vector<2x32xf32>
    %466 = arith.addf %461, %465 : vector<2x32xf32>
    %467 = math.tanh %466 : vector<2x32xf32>
    %468 = arith.subf %437, %467 : vector<2x32xf32>
    %469 = arith.mulf %460, %468 : vector<2x32xf32>
    %470 = arith.addf %467, %469 : vector<2x32xf32>
    %c5_i32_115 = arith.constant 5 : i32
    %471 = arith.index_cast %c5_i32_115 : i32 to index
    %c0_116 = arith.constant 0 : index
    %c0_117 = arith.constant 0 : index
    %472 = vector.load %arg12[%471, %c0_116, %c0_117] : memref<8x2x32xf32, #tpu.memory_space<vmem>>, vector<1x2x32xf32>
    %473 = vector.shape_cast %472 : vector<1x2x32xf32> to vector<2x32xf32>
    %cst_118 = arith.constant dense<0.000000e+00> : vector<2x96xf32>
    %474 = tpu.matmul %473, %301, %cst_118 {dimension_numbers = #tpu.dot_dimension_numbers<[1], [0], [0], [1], [0, 0, 1, 1], [], []>} : vector<2x32xf32>, vector<32x96xf32>, vector<2x96xf32> -> vector<2x96xf32>
    %475 = vector.broadcast %303 : vector<1x96xf32> to vector<2x96xf32>
    %476 = arith.addf %474, %475 : vector<2x96xf32>
    %cst_119 = arith.constant dense<0.000000e+00> : vector<2x96xf32>
    %477 = tpu.matmul %470, %302, %cst_119 {dimension_numbers = #tpu.dot_dimension_numbers<[1], [0], [0], [1], [0, 0, 1, 1], [], []>} : vector<2x32xf32>, vector<32x96xf32>, vector<2x96xf32> -> vector<2x96xf32>
    %478 = vector.extract_strided_slice %476 {offsets = [0, 0], sizes = [2, 32], strides = [1, 1]} : vector<2x96xf32> to vector<2x32xf32>
    %479 = vector.extract_strided_slice %477 {offsets = [0, 0], sizes = [2, 32], strides = [1, 1]} : vector<2x96xf32> to vector<2x32xf32>
    %480 = arith.addf %478, %479 : vector<2x32xf32>
    %481 = arith.negf %480 : vector<2x32xf32>
    %482 = math.exp %481 : vector<2x32xf32>
    %cst_120 = arith.constant 1.000000e+00 : f32
    %483 = vector.broadcast %cst_120 : f32 to vector<2x32xf32>
    %484 = arith.addf %483, %482 : vector<2x32xf32>
    %485 = arith.divf %483, %484 : vector<2x32xf32>
    %486 = vector.extract_strided_slice %476 {offsets = [0, 32], sizes = [2, 32], strides = [1, 1]} : vector<2x96xf32> to vector<2x32xf32>
    %487 = vector.extract_strided_slice %477 {offsets = [0, 32], sizes = [2, 32], strides = [1, 1]} : vector<2x96xf32> to vector<2x32xf32>
    %488 = arith.addf %486, %487 : vector<2x32xf32>
    %489 = arith.negf %488 : vector<2x32xf32>
    %490 = math.exp %489 : vector<2x32xf32>
    %cst_121 = arith.constant 1.000000e+00 : f32
    %491 = vector.broadcast %cst_121 : f32 to vector<2x32xf32>
    %492 = arith.addf %491, %490 : vector<2x32xf32>
    %493 = arith.divf %491, %492 : vector<2x32xf32>
    %494 = vector.extract_strided_slice %476 {offsets = [0, 64], sizes = [2, 32], strides = [1, 1]} : vector<2x96xf32> to vector<2x32xf32>
    %495 = vector.extract_strided_slice %477 {offsets = [0, 64], sizes = [2, 32], strides = [1, 1]} : vector<2x96xf32> to vector<2x32xf32>
    %496 = vector.broadcast %304 : vector<1x32xf32> to vector<2x32xf32>
    %497 = arith.addf %495, %496 : vector<2x32xf32>
    %498 = arith.mulf %485, %497 : vector<2x32xf32>
    %499 = arith.addf %494, %498 : vector<2x32xf32>
    %500 = math.tanh %499 : vector<2x32xf32>
    %501 = arith.subf %470, %500 : vector<2x32xf32>
    %502 = arith.mulf %493, %501 : vector<2x32xf32>
    %503 = arith.addf %500, %502 : vector<2x32xf32>
    %c6_i32_122 = arith.constant 6 : i32
    %504 = arith.index_cast %c6_i32_122 : i32 to index
    %c0_123 = arith.constant 0 : index
    %c0_124 = arith.constant 0 : index
    %505 = vector.load %arg12[%504, %c0_123, %c0_124] : memref<8x2x32xf32, #tpu.memory_space<vmem>>, vector<1x2x32xf32>
    %506 = vector.shape_cast %505 : vector<1x2x32xf32> to vector<2x32xf32>
    %cst_125 = arith.constant dense<0.000000e+00> : vector<2x96xf32>
    %507 = tpu.matmul %506, %301, %cst_125 {dimension_numbers = #tpu.dot_dimension_numbers<[1], [0], [0], [1], [0, 0, 1, 1], [], []>} : vector<2x32xf32>, vector<32x96xf32>, vector<2x96xf32> -> vector<2x96xf32>
    %508 = vector.broadcast %303 : vector<1x96xf32> to vector<2x96xf32>
    %509 = arith.addf %507, %508 : vector<2x96xf32>
    %cst_126 = arith.constant dense<0.000000e+00> : vector<2x96xf32>
    %510 = tpu.matmul %503, %302, %cst_126 {dimension_numbers = #tpu.dot_dimension_numbers<[1], [0], [0], [1], [0, 0, 1, 1], [], []>} : vector<2x32xf32>, vector<32x96xf32>, vector<2x96xf32> -> vector<2x96xf32>
    %511 = vector.extract_strided_slice %509 {offsets = [0, 0], sizes = [2, 32], strides = [1, 1]} : vector<2x96xf32> to vector<2x32xf32>
    %512 = vector.extract_strided_slice %510 {offsets = [0, 0], sizes = [2, 32], strides = [1, 1]} : vector<2x96xf32> to vector<2x32xf32>
    %513 = arith.addf %511, %512 : vector<2x32xf32>
    %514 = arith.negf %513 : vector<2x32xf32>
    %515 = math.exp %514 : vector<2x32xf32>
    %cst_127 = arith.constant 1.000000e+00 : f32
    %516 = vector.broadcast %cst_127 : f32 to vector<2x32xf32>
    %517 = arith.addf %516, %515 : vector<2x32xf32>
    %518 = arith.divf %516, %517 : vector<2x32xf32>
    %519 = vector.extract_strided_slice %509 {offsets = [0, 32], sizes = [2, 32], strides = [1, 1]} : vector<2x96xf32> to vector<2x32xf32>
    %520 = vector.extract_strided_slice %510 {offsets = [0, 32], sizes = [2, 32], strides = [1, 1]} : vector<2x96xf32> to vector<2x32xf32>
    %521 = arith.addf %519, %520 : vector<2x32xf32>
    %522 = arith.negf %521 : vector<2x32xf32>
    %523 = math.exp %522 : vector<2x32xf32>
    %cst_128 = arith.constant 1.000000e+00 : f32
    %524 = vector.broadcast %cst_128 : f32 to vector<2x32xf32>
    %525 = arith.addf %524, %523 : vector<2x32xf32>
    %526 = arith.divf %524, %525 : vector<2x32xf32>
    %527 = vector.extract_strided_slice %509 {offsets = [0, 64], sizes = [2, 32], strides = [1, 1]} : vector<2x96xf32> to vector<2x32xf32>
    %528 = vector.extract_strided_slice %510 {offsets = [0, 64], sizes = [2, 32], strides = [1, 1]} : vector<2x96xf32> to vector<2x32xf32>
    %529 = vector.broadcast %304 : vector<1x32xf32> to vector<2x32xf32>
    %530 = arith.addf %528, %529 : vector<2x32xf32>
    %531 = arith.mulf %518, %530 : vector<2x32xf32>
    %532 = arith.addf %527, %531 : vector<2x32xf32>
    %533 = math.tanh %532 : vector<2x32xf32>
    %534 = arith.subf %503, %533 : vector<2x32xf32>
    %535 = arith.mulf %526, %534 : vector<2x32xf32>
    %536 = arith.addf %533, %535 : vector<2x32xf32>
    %c7_i32_129 = arith.constant 7 : i32
    %537 = arith.index_cast %c7_i32_129 : i32 to index
    %c0_130 = arith.constant 0 : index
    %c0_131 = arith.constant 0 : index
    %538 = vector.load %arg12[%537, %c0_130, %c0_131] : memref<8x2x32xf32, #tpu.memory_space<vmem>>, vector<1x2x32xf32>
    %539 = vector.shape_cast %538 : vector<1x2x32xf32> to vector<2x32xf32>
    %cst_132 = arith.constant dense<0.000000e+00> : vector<2x96xf32>
    %540 = tpu.matmul %539, %301, %cst_132 {dimension_numbers = #tpu.dot_dimension_numbers<[1], [0], [0], [1], [0, 0, 1, 1], [], []>} : vector<2x32xf32>, vector<32x96xf32>, vector<2x96xf32> -> vector<2x96xf32>
    %541 = vector.broadcast %303 : vector<1x96xf32> to vector<2x96xf32>
    %542 = arith.addf %540, %541 : vector<2x96xf32>
    %cst_133 = arith.constant dense<0.000000e+00> : vector<2x96xf32>
    %543 = tpu.matmul %536, %302, %cst_133 {dimension_numbers = #tpu.dot_dimension_numbers<[1], [0], [0], [1], [0, 0, 1, 1], [], []>} : vector<2x32xf32>, vector<32x96xf32>, vector<2x96xf32> -> vector<2x96xf32>
    %544 = vector.extract_strided_slice %542 {offsets = [0, 0], sizes = [2, 32], strides = [1, 1]} : vector<2x96xf32> to vector<2x32xf32>
    %545 = vector.extract_strided_slice %543 {offsets = [0, 0], sizes = [2, 32], strides = [1, 1]} : vector<2x96xf32> to vector<2x32xf32>
    %546 = arith.addf %544, %545 : vector<2x32xf32>
    %547 = arith.negf %546 : vector<2x32xf32>
    %548 = math.exp %547 : vector<2x32xf32>
    %cst_134 = arith.constant 1.000000e+00 : f32
    %549 = vector.broadcast %cst_134 : f32 to vector<2x32xf32>
    %550 = arith.addf %549, %548 : vector<2x32xf32>
    %551 = arith.divf %549, %550 : vector<2x32xf32>
    %552 = vector.extract_strided_slice %542 {offsets = [0, 32], sizes = [2, 32], strides = [1, 1]} : vector<2x96xf32> to vector<2x32xf32>
    %553 = vector.extract_strided_slice %543 {offsets = [0, 32], sizes = [2, 32], strides = [1, 1]} : vector<2x96xf32> to vector<2x32xf32>
    %554 = arith.addf %552, %553 : vector<2x32xf32>
    %555 = arith.negf %554 : vector<2x32xf32>
    %556 = math.exp %555 : vector<2x32xf32>
    %cst_135 = arith.constant 1.000000e+00 : f32
    %557 = vector.broadcast %cst_135 : f32 to vector<2x32xf32>
    %558 = arith.addf %557, %556 : vector<2x32xf32>
    %559 = arith.divf %557, %558 : vector<2x32xf32>
    %560 = vector.extract_strided_slice %542 {offsets = [0, 64], sizes = [2, 32], strides = [1, 1]} : vector<2x96xf32> to vector<2x32xf32>
    %561 = vector.extract_strided_slice %543 {offsets = [0, 64], sizes = [2, 32], strides = [1, 1]} : vector<2x96xf32> to vector<2x32xf32>
    %562 = vector.broadcast %304 : vector<1x32xf32> to vector<2x32xf32>
    %563 = arith.addf %561, %562 : vector<2x32xf32>
    %564 = arith.mulf %551, %563 : vector<2x32xf32>
    %565 = arith.addf %560, %564 : vector<2x32xf32>
    %566 = math.tanh %565 : vector<2x32xf32>
    %567 = arith.subf %536, %566 : vector<2x32xf32>
    %568 = arith.mulf %559, %567 : vector<2x32xf32>
    %569 = arith.addf %566, %568 : vector<2x32xf32>
    %c8_i32_136 = arith.constant 8 : i32
    %c0_137 = arith.constant 0 : index
    %c0_138 = arith.constant 0 : index
    %570 = vector.load %arg9[%c0_137, %c0_138] : memref<32x8xf32, #tpu.memory_space<vmem>>, vector<32x8xf32>
    %cst_139 = arith.constant dense<0.000000e+00> : vector<2x8xf32>
    %571 = tpu.matmul %569, %570, %cst_139 {dimension_numbers = #tpu.dot_dimension_numbers<[1], [0], [0], [1], [0, 0, 1, 1], [], []>} : vector<2x32xf32>, vector<32x8xf32>, vector<2x8xf32> -> vector<2x8xf32>
    %c0_140 = arith.constant 0 : index
    %c0_141 = arith.constant 0 : index
    %572 = vector.load %arg10[%c0_140, %c0_141] : memref<1x8xf32, #tpu.memory_space<vmem>>, vector<1x8xf32>
    %573 = vector.broadcast %572 : vector<1x8xf32> to vector<2x8xf32>
    %574 = arith.addf %571, %573 : vector<2x8xf32>
    %c0_142 = arith.constant 0 : index
    %c0_143 = arith.constant 0 : index
    %575 = vector.load %arg11[%c0_142, %c0_143] : memref<2x8xf32, #tpu.memory_space<vmem>>, vector<2x8xf32>
    tpu.vector_store %arg11[%c0_142, %c0_143], %574 {strides = array<i32>} : memref<2x8xf32, #tpu.memory_space<vmem>>, vector<2x8xf32>,
    return
  }
}

</mosaic_0001>

<bundles_post_ra>
// kernel: tpu_custom_call.1
= control target key start
LH: loop header
LB: loop body
LE: loop exit
PB: predicated region body
PF: predicated region fallthrough
CT: control target
= control target key end

     0   :  { %16 = vsyncpa [#allocation4], 0  ;;  %s2436_s0 = inlined_call_operand.hbm [shape: f32[8,2,16], index: 0, kind: input, shape index: {}]   ;;  %s2437_s1 = inlined_call_operand.hbm [shape: f32[16,96], index: 1, kind: input, shape index: {}]   ;;  %s2438_s2 = inlined_call_operand.vmem [shape: f32[32,96], index: 2, kind: input, shape index: {}]   ;;  %s2439_s3 = inlined_call_operand.vmem [shape: f32[1,96], index: 3, kind: input, shape index: {}]   ;;  %s2440_s4 = inlined_call_operand.vmem [shape: f32[1,32], index: 4, kind: input, shape index: {}]   ;;  %s2441_s5 = inlined_call_operand.hbm [shape: f32[32,96], index: 5, kind: input, shape index: {}]   ;;  %s2442_s6 = inlined_call_operand.hbm [shape: f32[32,96], index: 6, kind: input, shape index: {}]   ;;  %s2443_s7 = inlined_call_operand.vmem [shape: f32[1,96], index: 7, kind: input, shape index: {}]   ;;  %s2444_s8 = inlined_call_operand.vmem [shape: f32[1,32], index: 8, kind: input, shape index: {}]   ;;  %s2445_s9 = inlined_call_operand.vmem [shape: f32[32,8], index: 9, kind: input, shape index: {}]   ;;  %s2446_s10 = inlined_call_operand.vmem [shape: f32[1,8], index: 10, kind: input, shape index: {}]   ;;  %s2447_s11 = inlined_call_operand.hbm [shape: f32[2,8], index: 11, kind: output, shape index: {}]  }
   0x1   :  { %17 = vsyncpa [#allocation7], 0 }
   0x2   :  { %18 = vsyncpa [#allocation10], 0  ;;  %s37_s19 = sshll.u32 %s2437_s1, 4  ;;  %s38_s19 = int_to_ptr.hbm [resolvable:$true] %s37_s19 }
   0x3   :  { %19 = vsyncpa [#allocation5], 0  ;;  %s1980_s20 = smov [#allocation6]   ;;  %s24_s24 = sshll.u32 %s2436_s0, 4  ;;  %s25_s24 = int_to_ptr.hbm [resolvable:$true] %s24_s24 }
   0x4   :  { %s39_s21 = sshll.u32 %s1980_s20, 4  ;;  %s1981_s25 = smov 128   ;;  %s40_s21 = int_to_ptr.vmem [resolvable:$true] %s39_s21 }
   0x5   :  { %s1982_s26 = smov 8   ;;  %s1983_s27 = smov [#allocation3]  }
   0x6   :  { %45 = dma.hbm_to_vmem [thread:$0]  %s38_s19, 256, %s40_s21, [#allocation7], %s1981_s25, %s1981_s25, %s1982_s26  }
   0x7   :  { %s26_s28 = sshll.u32 %s1983_s27, 4  ;;  %s1984_s29 = smov 32   ;;  %s27_s28 = int_to_ptr.vmem [resolvable:$true] %s26_s28 }
   0x8   :  { %s1985_s30 = smov 2   ;;  %s56_s13 = sshll.u32 %s2441_s5, 4  ;;  %s57_s13 = int_to_ptr.hbm [resolvable:$true] %s56_s13 }
   0x9   :  { %32 = dma.hbm_to_vmem [thread:$0]  %s25_s24, 256, %s27_s28, [#allocation4], %s1984_s29, %s1984_s29, %s1985_s30  }
   0xa   :  { %s1986_s14 = smov [#allocation8]   ;;  %s69_s17 = sshll.u32 %s2442_s6, 4  ;;  %s70_s17 = int_to_ptr.hbm [resolvable:$true] %s69_s17 }
   0xb   :  { %s58_s15 = sshll.u32 %s1986_s14, 4  ;;  %s1987_s18 = smov [#allocation9]   ;;  %s59_s15 = int_to_ptr.vmem [resolvable:$true] %s58_s15 }
   0xc   :  { %64 = dma.hbm_to_vmem [thread:$0]  %s57_s13, 512, %s59_s15, [#allocation7], %s1981_s25, %s1981_s25, %s1982_s26  }
   0xd   :  { %s71_s19 = sshll.u32 %s1987_s18, 4  ;;  %s72_s19 = int_to_ptr.vmem [resolvable:$true] %s71_s19 }
   0xe   :  { %77 = dma.hbm_to_vmem [thread:$0]  %s70_s17, 512, %s72_s19, [#allocation10], %s1981_s25, %s1981_s25, %s1982_s26  }
   0xf   :  { %1972 = dma.done.wait [#allocation4], 256  }
  0x10   :  { %1973 = vsyncadd [#allocation4], 4294967040 }
  0x11   :  { %1974 = dma.done.wait [#allocation7], 768  }
  0x12   :  { %1975 = vsyncadd [#allocation7], 4294966528 }
  0x13   :  { %1976 = dma.done.wait [#allocation10], 512  }
  0x14   :  { %1977 = vsyncadd [#allocation10], 4294966784  ;;  %v2069_v0 = vld [vmem:[%s2438_s2 + $0x18] sm:$0xff]  ;;  %v2071_v1 = vld [vmem:[#allocation6 + $0x8] sm:$0xff]  ;;  %vm114_vm0 = vcmask 130048   ;;  %s1988_s28 = smov 64  }
  0x15   :  { %v2076_v2 = vld [vmem:[%s2438_s2 + $0x10] sm:$0xff]  ;;  %154 = vmatpush.msra.mxu1 %v2069_v0  ;;  %132 = vmatpush.msra.mxu0 %v2071_v1  ;;  %v2080_v3 = vld [vmem:[#allocation6] sm:$0xff]  ;;  %v2085_v5 = vld [vmem:[%s2438_s2 + $0x8] sm:$0xff]  ;;  %v1989_v8 = vmov 0.0   ;;  %s1990_s30 = smov 96   ;;  %vm214_vm5 = vcmask 254976  }
  0x16   :  { %v110_v4 = vld [vmem:[#allocation3] sm:$0x3]  ;;  %v1750_v6 = vld [vmem:[%s2440_s4] ss:$0 sm:$0xff]  ;;  %255 = vmatpush.msra.mxu3 %v2069_v0  ;;  %235 = vmatpush.msra.mxu2 %v2071_v1  ;;  %v313_v37 = vld [vmem:[#allocation3 + $0x4] sm:$0x3] }
  0x17   :  { %155 = vmatpush.msra.mxu1 %v2076_v2  ;;  %133 = vmatpush.msra.mxu0 %v2080_v3  ;;  %v2098_v7 = vld [vmem:[%s2438_s2] sm:$0xff]  ;;  %v217_v38 = vld [vmem:[#allocation3 + $0x2] sm:$0x3]  ;;  %v505_v39 = vld [vmem:[#allocation3 + $0x8] sm:$0x3]  ;;  %vm138_vm6 = vcmask 261120  }
  0x18   :  { %1691 = vmatmul.msk.f32.vlgmr.msra.gmra.mxu0 %vm114_vm0, %v110_v4  ;;  %184 = vrot.lane.b32.xlu0 %v1750_v6, %s1988_s28  ;;  %v2131_v12 = vld [vmem:[%s2439_s3] ss:$0 sm:$0xff]  ;;  %v697_v42 = vld [vmem:[#allocation3 + $0xc] sm:$0x3]  ;;  %v2151_v43 = vld [vmem:[#allocation8 + $0x18] sm:$0xff]  ;;  %s1991_s6 = smov [#allocation11]  }
  0x19   :  { %156 = vmatpush.msra.mxu1 %v2085_v5  ;;  %331 = vmatpush.msrb.mxu0 %v2071_v1  ;;  %v2153_v44 = vld [vmem:[#allocation8 + $0x10] sm:$0xff]  ;;  %v2156_v45 = vld [vmem:[#allocation8 + $0x8] sm:$0xff]  ;;  %v2159_v46 = vld [vmem:[#allocation8] sm:$0xff]  ;;  %s1677_s21 = sshll.u32 %s1991_s6, 4  ;;  %s1679_s24 = sshll.u32 %s2447_s11, 4  ;;  %s1678_s21 = int_to_ptr.vmem [resolvable:$true] %s1677_s21  ;;  %s1680_s24 = int_to_ptr.hbm [resolvable:$true] %s1679_s24 }
  0x1a   :  { %256 = vmatpush.msra.mxu3 %v2076_v2  ;;  %236 = vmatpush.msra.mxu2 %v2080_v3 }
  0x1b   :  { %157 = vmatpush.msra.mxu1 %v2098_v7  ;;  %332 = vmatpush.msrb.mxu0 %v2080_v3 }
  0x1c   :  { %158 = vmatmul.f32.vlgmr.msra.gmra.mxu1 %v1989_v8  ;;  %257 = vmatpush.msra.mxu3 %v2085_v5 }
  0x1d   :  { %523 = vmatpush.msra.mxu0 %v2071_v1  ;;  %427 = vmatpush.msrb.mxu1 %v2071_v1 }
  0x1e   :  { %351 = vmatpush.msrb.mxu2 %v2069_v0  ;;  %258 = vmatpush.msra.mxu3 %v2098_v7 }
  0x1f   :  { %524 = vmatpush.msra.mxu0 %v2080_v3  ;;  %428 = vmatpush.msrb.mxu1 %v2080_v3 }
  0x20   :  { %352 = vmatpush.msrb.mxu2 %v2076_v2  ;;  %447 = vmatpush.msrb.mxu3 %v2069_v0 }
  0x21   :  { %619 = vmatpush.msra.mxu1 %v2071_v1  ;;  %1696 = vmatmul.msk.f32.vlgmr.msrb.gmra.mxu0 %vm114_vm0, %v313_v37 }
  0x22   :  { %353 = vmatpush.msrb.mxu2 %v2085_v5  ;;  %448 = vmatpush.msrb.mxu3 %v2076_v2 }
  0x23   :  { %620 = vmatpush.msra.mxu1 %v2080_v3  ;;  %1693 = vmatmul.msk.f32.vlgmr.msra.gmra.mxu2 %vm114_vm0, %v217_v38 }
  0x24   :  { %354 = vmatpush.msrb.mxu2 %v2098_v7  ;;  %449 = vmatpush.msrb.mxu3 %v2085_v5 }
  0x25   :  { %715 = vmatpush.msrb.mxu0 %v2071_v1 }
  0x26   :  { %450 = vmatpush.msrb.mxu3 %v2098_v7  ;;  %543 = vmatpush.msra.mxu2 %v2069_v0 }
  0x27   :  { %716 = vmatpush.msrb.mxu0 %v2080_v3 }
  0x28   :  { %544 = vmatpush.msra.mxu2 %v2076_v2 }
  0x29   :  { %1702 = vmatmul.msk.f32.vlgmr.msra.gmra.mxu0 %vm114_vm0, %v505_v39 }
  0x2a   :  { %545 = vmatpush.msra.mxu2 %v2085_v5  ;;  %917 = vmatpush.msra.mxu0 %v2151_v43 }
  0x2c   :  { %546 = vmatpush.msra.mxu2 %v2098_v7  ;;  %918 = vmatpush.msra.mxu0 %v2153_v44 }
  0x2e   :  { %919 = vmatpush.msra.mxu0 %v2156_v45 }
  0x30   :  { %920 = vmatpush.msra.mxu0 %v2159_v46 }
  0x31   :  { %1708 = vmatmul.msk.f32.vlgmr.msrb.gmra.mxu0 %vm114_vm0, %v697_v42 }
  0x32   :  { %1101 = vmatpush.msrb.mxu0 %v2151_v43 }
  0x34   :  { %1102 = vmatpush.msrb.mxu0 %v2153_v44 }
  0x36   :  { %1103 = vmatpush.msrb.mxu0 %v2156_v45 }
  0x38   :  { %1104 = vmatpush.msrb.mxu0 %v2159_v46 }
  0x8a   :  { %v2124_v9 = vpop.permute.xlu0 %184 }
  0x95   :  { %v135_v13 = vpop.f32.mrf.mxu0 }
  0x96   :  { %v136_v14 = vadd.f32 %v2131_v12, %v135_v13 }
  0x99   :  { %v159_v10 = vpop.f32.mrf.mxu1 }
  0x9a   :  { %v187_v11 = vadd.f32 %v2124_v9, %v159_v10  ;;  %v162_v15 = vadd.f32 %v159_v10, %v136_v14 }
  0x9c   :  { %189 = vrot.lane.b32.xlu0 %v187_v11, %s1988_s28  ;;  %v1692_v16 = vmul.f32 -1.442695, %v162_v15 }
  0x9e   :  { %1755 = vpow2.f32 %v1692_v16 }
  0xa4   :  { %v1756_v17 = vpop.eup %1755 }
  0xa5   :  { %v166_v18 = vadd.f32 1.0, %v1756_v17 }
  0xa6   :  { %v238_v51 = vpop.f32.mrf.mxu2 }
  0xa7   :  { %1757 = vrcp.f32 %v166_v18  ;;  %v178_v24 = vand.u32 2147483648, %v166_v18  ;;  %vm172_vm2 = vweird.f32 %v166_v18  ;;  %v176_v25 = vand.u32 2147483647, %v166_v18 }
  0xa8   :  { %v239_v52 = vadd.f32 %v2131_v12, %v238_v51 }
  0xa9   :  { %v179_v27 = vor.u32 1.1754944e-38, %v178_v24  ;;  %vm177_vm4 = vcmp.eq.f32.partialorder %v176_v25, 8.507059e+37  ;;  %v793_v24 = vld [vmem:[#allocation3 + $0xe] sm:$0x3] }
  0xad   :  { %v1758_v19 = vpop.eup %1757 }
  0xae   :  { %v168_v20 = vmul.f32 %v1758_v19, %v166_v18  ;;  %vm173_vm1 = vweird.f32 %v1758_v19 }
  0xaf   :  { %vm174_vm3 = vmor %vm172_vm2, %vm173_vm1 }
  0xb0   :  { %v169_v21 = vsub.f32 1.0, %v168_v20  ;;  %v409_v20 = vld [vmem:[#allocation3 + $0x6] sm:$0x3] }
  0xb1   :  { %1699 = vmatmul.msk.f32.vlgmr.msrb.gmra.mxu1 %vm114_vm0, %v409_v20 }
  0xb2   :  { %v170_v22 = vmul.f32 %v1758_v19, %v169_v21  ;;  %811 = vmatpush.msrb.mxu1 %v2071_v1  ;;  %v601_v21 = vld [vmem:[#allocation3 + $0xa] sm:$0x3] }
  0xb4   :  { %v171_v23 = vadd.f32 %v1758_v19, %v170_v22  ;;  %812 = vmatpush.msrb.mxu1 %v2080_v3 }
  0xb6   :  { %v175_v26 = vsel %vm174_vm3, %v1758_v19, %v171_v23 }
  0xb7   :  { %v180_v29 = vsel %vm177_vm4, %v179_v27, %v175_v26  ;;  %v334_v27 = vpop.f32.mrf.mxu0 }
  0xb9   :  { %1705 = vmatmul.msk.f32.vlgmr.msra.gmra.mxu1 %vm114_vm0, %v601_v21 }
  0xba   :  { %1009 = vmatpush.msra.mxu1 %v2151_v43 }
  0xbc   :  { %1010 = vmatpush.msra.mxu1 %v2153_v44 }
  0xbe   :  { %1011 = vmatpush.msra.mxu1 %v2156_v45 }
  0xc0   :  { %1012 = vmatpush.msra.mxu1 %v2159_v46 }
  0xc1   :  { %1711 = vmatmul.msk.f32.vlgmr.msrb.gmra.mxu1 %vm114_vm0, %v793_v24 }
  0xc2   :  { %1193 = vmatpush.msrb.mxu1 %v2151_v43 }
  0xc4   :  { %1194 = vmatpush.msrb.mxu1 %v2153_v44 }
  0xc6   :  { %1195 = vmatpush.msrb.mxu1 %v2156_v45 }
  0xc8   :  { %1196 = vmatpush.msrb.mxu1 %v2159_v46 }
 0x10e   :  { %v190_v28 = vpop.permute.xlu0 %189 }
 0x10f   :  { %v192_v30 = vmul.f32 %v190_v28, %v180_v29  ;;  %v335_v28 = vadd.f32 %v2131_v12, %v334_v27 }
 0x111   :  { %194 = vrot.lane.b32.xlu1 %v192_v30, %s1988_s28 }
 0x183   :  { %v195_v31 = vpop.permute.xlu1 %194 }
 0x184   :  { %v197_v32 = vadd.f32 %v195_v31, %v136_v14 }
 0x186   :  { %1759 = vtanh.f32 %v197_v32 }
 0x18c   :  { %v1760_v33 = vpop.eup %1759 }
 0x18d   :  { %v199_v34 = vsub.f32 0.0, %v1760_v33 }
 0x18f   :  { %201 = vrot.lane.b32.xlu1 %v199_v34, %s1990_s30 }
 0x201   :  { %v202_v35 = vpop.permute.xlu1 %201 }
 0x202   :  { %v204_v36 = vmul.f32 %v202_v35, %v180_v29 }
 0x204   :  { %206 = vrot.lane.b32.xlu2 %v204_v36, %s1984_s29 }
 0x25e   :  { %v207_v40 = vpop.permute.xlu2 %206 }
 0x25f   :  { %v2146_v41 = vadd.f32 %v1760_v33, %v207_v40 }
 0x261   :  { %211 = vrot.lane.b32.xlu2 %v2146_v41, %s1988_s28 }
 0x2bb   :  { %v212_v47 = vpop.permute.xlu2 %211 }
 0x2bc   :  { %215 = vst.msk [vmem:[#allocation2] sm:$0x3] %vm214_vm5, %v212_v47  ;;  %1694 = vmatmul.msk.f32.vlgmr.msra.gmra.mxu3 %vm138_vm6, %v212_v47 }
 0x2bd   :  { %639 = vmatpush.msra.mxu3 %v2069_v0 }
 0x2bf   :  { %640 = vmatpush.msra.mxu3 %v2076_v2 }
 0x2c1   :  { %641 = vmatpush.msra.mxu3 %v2085_v5 }
 0x2c3   :  { %v898_v48 = vld [vmem:[#allocation2] sm:$0x3]  ;;  %642 = vmatpush.msra.mxu3 %v2098_v7 }
 0x2c4   :  { %1714 = vmatmul.msk.f32.vlgmr.msra.gmra.mxu0 %vm138_vm6, %v898_v48 }
 0x2c5   :  { %1285 = vmatpush.msra.mxu0 %v2151_v43 }
 0x2c7   :  { %1286 = vmatpush.msra.mxu0 %v2153_v44 }
 0x2c9   :  { %1287 = vmatpush.msra.mxu0 %v2156_v45 }
 0x2cb   :  { %1288 = vmatpush.msra.mxu0 %v2159_v46 }
 0x33f   :  { %v260_v49 = vpop.f32.mrf.mxu3 }
 0x340   :  { %v283_v50 = vadd.f32 %v260_v49, %v2124_v9  ;;  %v263_v53 = vadd.f32 %v260_v49, %v239_v52 }
 0x342   :  { %285 = vrot.lane.b32.xlu0 %v283_v50, %s1988_s28  ;;  %v1695_v54 = vmul.f32 -1.442695, %v263_v53 }
 0x344   :  { %1761 = vpow2.f32 %v1695_v54 }
 0x34a   :  { %v1762_v55 = vpop.eup %1761 }
 0x34b   :  { %v267_v56 = vadd.f32 1.0, %v1762_v55 }
 0x34d   :  { %1763 = vrcp.f32 %v267_v56  ;;  %v279_v62 = vand.u32 2147483648, %v267_v56  ;;  %vm273_vm8 = vweird.f32 %v267_v56  ;;  %v277_v63 = vand.u32 2147483647, %v267_v56 }
 0x34f   :  { %v280_v6 = vor.u32 1.1754944e-38, %v279_v62  ;;  %vm278_vm10 = vcmp.eq.f32.partialorder %v277_v63, 8.507059e+37 }
 0x353   :  { %v1764_v57 = vpop.eup %1763 }
 0x354   :  { %v269_v58 = vmul.f32 %v1764_v57, %v267_v56  ;;  %vm274_vm7 = vweird.f32 %v1764_v57 }
 0x355   :  { %vm275_vm9 = vmor %vm273_vm8, %vm274_vm7 }
 0x356   :  { %v270_v59 = vsub.f32 1.0, %v269_v58 }
 0x358   :  { %v271_v60 = vmul.f32 %v1764_v57, %v270_v59 }
 0x35a   :  { %v272_v61 = vadd.f32 %v1764_v57, %v271_v60 }
 0x35c   :  { %v276_v4 = vsel %vm275_vm9, %v1764_v57, %v272_v61 }
 0x35d   :  { %v281_v11 = vsel %vm278_vm10, %v280_v6, %v276_v4 }
 0x3b4   :  { %v286_v10 = vpop.permute.xlu0 %285 }
 0x3b5   :  { %v288_v13 = vmul.f32 %v286_v10, %v281_v11 }
 0x3b7   :  { %290 = vrot.lane.b32.xlu1 %v288_v13, %s1988_s28 }
 0x429   :  { %v291_v14 = vpop.permute.xlu1 %290 }
 0x42a   :  { %v293_v15 = vadd.f32 %v291_v14, %v239_v52 }
 0x42c   :  { %1765 = vtanh.f32 %v293_v15 }
 0x432   :  { %v1766_v16 = vpop.eup %1765 }
 0x433   :  { %v295_v17 = vsub.f32 %v2146_v41, %v1766_v16 }
 0x435   :  { %297 = vrot.lane.b32.xlu2 %v295_v17, %s1990_s30 }
 0x48f   :  { %v298_v18 = vpop.permute.xlu2 %297 }
 0x490   :  { %v300_v19 = vmul.f32 %v298_v18, %v281_v11 }
 0x492   :  { %302 = vrot.lane.b32.xlu0 %v300_v19, %s1984_s29 }
 0x504   :  { %v303_v22 = vpop.permute.xlu0 %302 }
 0x505   :  { %v305_v23 = vadd.f32 %v1766_v16, %v303_v22 }
 0x507   :  { %307 = vrot.lane.b32.xlu1 %v305_v23, %s1988_s28 }
 0x579   :  { %v308_v1 = vpop.permute.xlu1 %307 }
 0x57a   :  { %311 = vst.msk [vmem:[#allocation2 + $0x2] sm:$0x3] %vm214_vm5, %v308_v1  ;;  %1697 = vmatmul.msk.f32.vlgmr.msrb.gmra.mxu2 %vm138_vm6, %v308_v1 }
 0x57b   :  { %735 = vmatpush.msrb.mxu2 %v2069_v0 }
 0x57d   :  { %736 = vmatpush.msrb.mxu2 %v2076_v2 }
 0x57f   :  { %737 = vmatpush.msrb.mxu2 %v2085_v5 }
 0x581   :  { %v993_v3 = vld [vmem:[#allocation2 + $0x2] sm:$0x3]  ;;  %738 = vmatpush.msrb.mxu2 %v2098_v7 }
 0x582   :  { %1716 = vmatmul.msk.f32.vlgmr.msra.gmra.mxu1 %vm138_vm6, %v993_v3 }
 0x583   :  { %1377 = vmatpush.msra.mxu1 %v2151_v43 }
 0x585   :  { %1378 = vmatpush.msra.mxu1 %v2153_v44 }
 0x587   :  { %1379 = vmatpush.msra.mxu1 %v2156_v45 }
 0x589   :  { %1380 = vmatpush.msra.mxu1 %v2159_v46 }
 0x5fd   :  { %v356_v25 = vpop.f32.mrf.mxu2 }
 0x5fe   :  { %v379_v26 = vadd.f32 %v356_v25, %v2124_v9  ;;  %v359_v29 = vadd.f32 %v356_v25, %v335_v28 }
 0x600   :  { %381 = vrot.lane.b32.xlu2 %v379_v26, %s1988_s28  ;;  %v1698_v30 = vmul.f32 -1.442695, %v359_v29 }
 0x602   :  { %1767 = vpow2.f32 %v1698_v30  ;;  %v526_v30 = vpop.f32.mrf.mxu0 }
 0x608   :  { %v1768_v31 = vpop.eup %1767 }
 0x609   :  { %v363_v32 = vadd.f32 1.0, %v1768_v31  ;;  %v527_v31 = vadd.f32 %v2131_v12, %v526_v30 }
 0x60b   :  { %1769 = vrcp.f32 %v363_v32  ;;  %v375_v38 = vand.u32 2147483648, %v363_v32  ;;  %vm369_vm12 = vweird.f32 %v363_v32  ;;  %v373_v39 = vand.u32 2147483647, %v363_v32 }
 0x60d   :  { %v376_v41 = vor.u32 1.1754944e-38, %v375_v38  ;;  %vm374_vm14 = vcmp.eq.f32.partialorder %v373_v39, 8.507059e+37 }
 0x611   :  { %v1770_v33 = vpop.eup %1769 }
 0x612   :  { %v365_v34 = vmul.f32 %v1770_v33, %v363_v32  ;;  %vm370_vm11 = vweird.f32 %v1770_v33 }
 0x613   :  { %vm371_vm13 = vmor %vm369_vm12, %vm370_vm11 }
 0x614   :  { %v366_v35 = vsub.f32 1.0, %v365_v34 }
 0x616   :  { %v367_v36 = vmul.f32 %v1770_v33, %v366_v35 }
 0x618   :  { %v368_v37 = vadd.f32 %v1770_v33, %v367_v36 }
 0x61a   :  { %v372_v40 = vsel %vm371_vm13, %v1770_v33, %v368_v37 }
 0x61b   :  { %v377_v47 = vsel %vm374_vm14, %v376_v41, %v372_v40 }
 0x65a   :  { %v382_v42 = vpop.permute.xlu2 %381 }
 0x65b   :  { %v384_v48 = vmul.f32 %v382_v42, %v377_v47 }
 0x65d   :  { %386 = vrot.lane.b32.xlu0 %v384_v48, %s1988_s28 }
 0x6cf   :  { %v387_v49 = vpop.permute.xlu0 %386 }
 0x6d0   :  { %v389_v50 = vadd.f32 %v387_v49, %v335_v28 }
 0x6d2   :  { %1771 = vtanh.f32 %v389_v50 }
 0x6d8   :  { %v1772_v51 = vpop.eup %1771 }
 0x6d9   :  { %v391_v52 = vsub.f32 %v305_v23, %v1772_v51 }
 0x6db   :  { %393 = vrot.lane.b32.xlu1 %v391_v52, %s1990_s30 }
 0x74d   :  { %v394_v53 = vpop.permute.xlu1 %393 }
 0x74e   :  { %v396_v54 = vmul.f32 %v394_v53, %v377_v47 }
 0x750   :  { %398 = vrot.lane.b32.xlu2 %v396_v54, %s1984_s29 }
 0x7aa   :  { %v399_v55 = vpop.permute.xlu2 %398 }
 0x7ab   :  { %v401_v56 = vadd.f32 %v1772_v51, %v399_v55 }
 0x7ad   :  { %403 = vrot.lane.b32.xlu0 %v401_v56, %s1988_s28 }
 0x81f   :  { %v404_v57 = vpop.permute.xlu0 %403 }
 0x820   :  { %407 = vst.msk [vmem:[#allocation2 + $0x4] sm:$0x3] %vm214_vm5, %v404_v57  ;;  %1700 = vmatmul.msk.f32.vlgmr.msrb.gmra.mxu3 %vm138_vm6, %v404_v57 }
 0x821   :  { %831 = vmatpush.msrb.mxu3 %v2069_v0 }
 0x823   :  { %832 = vmatpush.msrb.mxu3 %v2076_v2  ;;  %v430_v2 = vpop.f32.mrf.mxu1 }
 0x825   :  { %833 = vmatpush.msrb.mxu3 %v2085_v5  ;;  %v431_v5 = vadd.f32 %v2131_v12, %v430_v2 }
 0x827   :  { %v1085_v58 = vld [vmem:[#allocation2 + $0x4] sm:$0x3]  ;;  %834 = vmatpush.msrb.mxu3 %v2098_v7 }
 0x828   :  { %1719 = vmatmul.msk.f32.vlgmr.msrb.gmra.mxu0 %vm138_vm6, %v1085_v58 }
 0x829   :  { %1469 = vmatpush.msrb.mxu0 %v2151_v43 }
 0x82b   :  { %1470 = vmatpush.msrb.mxu0 %v2153_v44 }
 0x82d   :  { %1471 = vmatpush.msrb.mxu0 %v2156_v45 }
 0x82f   :  { %1472 = vmatpush.msrb.mxu0 %v2159_v46 }
 0x8a3   :  { %v452_v59 = vpop.f32.mrf.mxu3 }
 0x8a4   :  { %v475_v0 = vadd.f32 %v452_v59, %v2124_v9  ;;  %v455_v60 = vadd.f32 %v452_v59, %v431_v5 }
 0x8a6   :  { %477 = vrot.lane.b32.xlu1 %v475_v0, %s1988_s28  ;;  %v1701_v7 = vmul.f32 -1.442695, %v455_v60  ;;  %v622_v0 = vpop.f32.mrf.mxu1 }
 0x8a7   :  { %v623_v2 = vadd.f32 %v2131_v12, %v622_v0 }
 0x8a8   :  { %1773 = vpow2.f32 %v1701_v7 }
 0x8ae   :  { %v1774_v61 = vpop.eup %1773 }
 0x8af   :  { %v459_v62 = vadd.f32 1.0, %v1774_v61 }
 0x8b1   :  { %1775 = vrcp.f32 %v459_v62  ;;  %v471_v13 = vand.u32 2147483648, %v459_v62  ;;  %vm465_vm0 = vweird.f32 %v459_v62  ;;  %v469_v14 = vand.u32 2147483647, %v459_v62 }
 0x8b3   :  { %v472_v16 = vor.u32 1.1754944e-38, %v471_v13  ;;  %vm470_vm2 = vcmp.eq.f32.partialorder %v469_v14, 8.507059e+37 }
 0x8b7   :  { %v1776_v63 = vpop.eup %1775 }
 0x8b8   :  { %v461_v4 = vmul.f32 %v1776_v63, %v459_v62  ;;  %vm466_vm15 = vweird.f32 %v1776_v63 }
 0x8b9   :  { %vm467_vm1 = vmor %vm465_vm0, %vm466_vm15 }
 0x8ba   :  { %v462_v6 = vsub.f32 1.0, %v461_v4 }
 0x8bc   :  { %v463_v10 = vmul.f32 %v1776_v63, %v462_v6 }
 0x8be   :  { %v464_v11 = vadd.f32 %v1776_v63, %v463_v10 }
 0x8c0   :  { %v468_v15 = vsel %vm467_vm1, %v1776_v63, %v464_v11 }
 0x8c1   :  { %v473_v18 = vsel %vm470_vm2, %v472_v16, %v468_v15 }
 0x918   :  { %v478_v17 = vpop.permute.xlu1 %477 }
 0x919   :  { %v480_v19 = vmul.f32 %v478_v17, %v473_v18 }
 0x91b   :  { %482 = vrot.lane.b32.xlu2 %v480_v19, %s1988_s28 }
 0x975   :  { %v483_v20 = vpop.permute.xlu2 %482 }
 0x976   :  { %v485_v21 = vadd.f32 %v483_v20, %v431_v5 }
 0x978   :  { %1777 = vtanh.f32 %v485_v21 }
 0x97e   :  { %v1778_v22 = vpop.eup %1777 }
 0x97f   :  { %v487_v23 = vsub.f32 %v401_v56, %v1778_v22 }
 0x981   :  { %489 = vrot.lane.b32.xlu0 %v487_v23, %s1990_s30 }
 0x9f3   :  { %v490_v24 = vpop.permute.xlu0 %489 }
 0x9f4   :  { %v492_v1 = vmul.f32 %v490_v24, %v473_v18 }
 0x9f6   :  { %494 = vrot.lane.b32.xlu1 %v492_v1, %s1984_s29 }
 0xa68   :  { %v495_v3 = vpop.permute.xlu1 %494 }
 0xa69   :  { %v497_v25 = vadd.f32 %v1778_v22, %v495_v3 }
 0xa6b   :  { %499 = vrot.lane.b32.xlu2 %v497_v25, %s1988_s28 }
 0xac5   :  { %v500_v26 = vpop.permute.xlu2 %499 }
 0xac6   :  { %503 = vst.msk [vmem:[#allocation2 + $0x6] sm:$0x3] %vm214_vm5, %v500_v26  ;;  %1703 = vmatmul.msk.f32.vlgmr.msra.gmra.mxu2 %vm138_vm6, %v500_v26  ;;  %v2264_v26 = vld [vmem:[#allocation9 + $0x10] sm:$0xff] }
 0xacd   :  { %v1177_v27 = vld [vmem:[#allocation2 + $0x6] sm:$0x3] }
 0xace   :  { %1722 = vmatmul.msk.f32.vlgmr.msrb.gmra.mxu1 %vm138_vm6, %v1177_v27  ;;  %v2268_v27 = vld [vmem:[#allocation9 + $0x8] sm:$0xff] }
 0xacf   :  { %1561 = vmatpush.msrb.mxu1 %v2151_v43 }
 0xad1   :  { %1562 = vmatpush.msrb.mxu1 %v2153_v44 }
 0xad3   :  { %1563 = vmatpush.msrb.mxu1 %v2156_v45 }
 0xad5   :  { %1564 = vmatpush.msrb.mxu1 %v2159_v46 }
 0xb49   :  { %v548_v28 = vpop.f32.mrf.mxu2 }
 0xb4a   :  { %v571_v29 = vadd.f32 %v548_v28, %v2124_v9  ;;  %v551_v32 = vadd.f32 %v548_v28, %v527_v31  ;;  %v2272_v28 = vld [vmem:[#allocation9] sm:$0xff] }
 0xb4c   :  { %573 = vrot.lane.b32.xlu0 %v571_v29, %s1988_s28  ;;  %v1704_v33 = vmul.f32 -1.442695, %v551_v32  ;;  %v1753_v29 = vld [vmem:[%s2444_s8] ss:$0 sm:$0xff] }
 0xb4e   :  { %1779 = vpow2.f32 %v1704_v33 }
 0xb54   :  { %v1780_v34 = vpop.eup %1779 }
 0xb55   :  { %v555_v35 = vadd.f32 1.0, %v1780_v34 }
 0xb57   :  { %1781 = vrcp.f32 %v555_v35  ;;  %v567_v46 = vand.u32 2147483648, %v555_v35  ;;  %vm561_vm4 = vweird.f32 %v555_v35  ;;  %v565_v38 = vand.u32 2147483647, %v555_v35 }
 0xb59   :  { %v568_v40 = vor.u32 1.1754944e-38, %v567_v46  ;;  %vm566_vm8 = vcmp.eq.f32.partialorder %v565_v38, 8.507059e+37  ;;  %v2304_v38 = vld [vmem:[%s2443_s7] ss:$0 sm:$0xff] }
 0xb5d   :  { %v1782_v43 = vpop.eup %1781 }
 0xb5e   :  { %v557_v44 = vmul.f32 %v1782_v43, %v555_v35  ;;  %vm562_vm3 = vweird.f32 %v1782_v43 }
 0xb5f   :  { %vm563_vm7 = vmor %vm561_vm4, %vm562_vm3 }
 0xb60   :  { %v558_v36 = vsub.f32 1.0, %v557_v44 }
 0xb62   :  { %v559_v45 = vmul.f32 %v1782_v43, %v558_v36 }
 0xb64   :  { %v560_v37 = vadd.f32 %v1782_v43, %v559_v45 }
 0xb66   :  { %v564_v39 = vsel %vm563_vm7, %v1782_v43, %v560_v37  ;;  %v718_v43 = vpop.f32.mrf.mxu0 }
 0xb67   :  { %v569_v42 = vsel %vm566_vm8, %v568_v40, %v564_v39  ;;  %v719_v44 = vadd.f32 %v2131_v12, %v718_v43 }
 0xb6e   :  { %v922_v40 = vpop.f32.mrf.mxu0 }
 0xbbe   :  { %v574_v41 = vpop.permute.xlu0 %573 }
 0xbbf   :  { %v576_v47 = vmul.f32 %v574_v41, %v569_v42  ;;  %v923_v41 = vadd.f32 %v2304_v38, %v922_v40 }
 0xbc1   :  { %578 = vrot.lane.b32.xlu1 %v576_v47, %s1988_s28 }
 0xc33   :  { %v579_v48 = vpop.permute.xlu1 %578 }
 0xc34   :  { %v581_v49 = vadd.f32 %v579_v48, %v527_v31 }
 0xc36   :  { %1783 = vtanh.f32 %v581_v49 }
 0xc3c   :  { %v1784_v50 = vpop.eup %1783 }
 0xc3d   :  { %v583_v51 = vsub.f32 %v497_v25, %v1784_v50  ;;  %v2262_v25 = vld [vmem:[#allocation9 + $0x18] sm:$0xff] }
 0xc3e   :  { %937 = vmatpush.msra.mxu2 %v2262_v25 }
 0xc3f   :  { %585 = vrot.lane.b32.xlu2 %v583_v51, %s1990_s30 }
 0xc40   :  { %938 = vmatpush.msra.mxu2 %v2264_v26 }
 0xc42   :  { %939 = vmatpush.msra.mxu2 %v2268_v27 }
 0xc44   :  { %940 = vmatpush.msra.mxu2 %v2272_v28 }
 0xc99   :  { %v586_v52 = vpop.permute.xlu2 %585 }
 0xc9a   :  { %v588_v53 = vmul.f32 %v586_v52, %v569_v42 }
 0xc9c   :  { %590 = vrot.lane.b32.xlu0 %v588_v53, %s1984_s29 }
 0xd0e   :  { %v591_v54 = vpop.permute.xlu0 %590 }
 0xd0f   :  { %v593_v55 = vadd.f32 %v1784_v50, %v591_v54 }
 0xd11   :  { %595 = vrot.lane.b32.xlu1 %v593_v55, %s1988_s28 }
 0xd83   :  { %v596_v56 = vpop.permute.xlu1 %595 }
 0xd84   :  { %599 = vst.msk [vmem:[#allocation2 + $0x8] sm:$0x3] %vm214_vm5, %v596_v56  ;;  %1706 = vmatmul.msk.f32.vlgmr.msra.gmra.mxu3 %vm138_vm6, %v596_v56 }
 0xd85   :  { %1034 = vmatpush.msra.mxu3 %v2262_v25 }
 0xd87   :  { %1035 = vmatpush.msra.mxu3 %v2264_v26 }
 0xd89   :  { %1036 = vmatpush.msra.mxu3 %v2268_v27 }
 0xd8b   :  { %v1269_v57 = vld [vmem:[#allocation2 + $0x8] sm:$0x3]  ;;  %1037 = vmatpush.msra.mxu3 %v2272_v28 }
 0xd8c   :  { %1725 = vmatmul.msk.f32.vlgmr.msra.gmra.mxu0 %vm138_vm6, %v1269_v57 }
 0xe07   :  { %v644_v58 = vpop.f32.mrf.mxu3 }
 0xe08   :  { %v667_v59 = vadd.f32 %v644_v58, %v2124_v9  ;;  %v647_v5 = vadd.f32 %v644_v58, %v623_v2 }
 0xe0a   :  { %669 = vrot.lane.b32.xlu2 %v667_v59, %s1988_s28  ;;  %v1707_v60 = vmul.f32 -1.442695, %v647_v5 }
 0xe0c   :  { %1785 = vpow2.f32 %v1707_v60 }
 0xe12   :  { %v1786_v7 = vpop.eup %1785 }
 0xe13   :  { %v651_v61 = vadd.f32 1.0, %v1786_v7 }
 0xe15   :  { %1787 = vrcp.f32 %v651_v61  ;;  %v663_v11 = vand.u32 2147483648, %v651_v61  ;;  %vm657_vm10 = vweird.f32 %v651_v61  ;;  %v661_v13 = vand.u32 2147483647, %v651_v61 }
 0xe17   :  { %v664_v15 = vor.u32 1.1754944e-38, %v663_v11  ;;  %vm662_vm12 = vcmp.eq.f32.partialorder %v661_v13, 8.507059e+37 }
 0xe1b   :  { %v1788_v62 = vpop.eup %1787 }
 0xe1c   :  { %v653_v63 = vmul.f32 %v1788_v62, %v651_v61  ;;  %vm658_vm9 = vweird.f32 %v1788_v62 }
 0xe1d   :  { %vm659_vm11 = vmor %vm657_vm10, %vm658_vm9 }
 0xe1e   :  { %v654_v4 = vsub.f32 1.0, %v653_v63 }
 0xe20   :  { %v655_v6 = vmul.f32 %v1788_v62, %v654_v4 }
 0xe22   :  { %v656_v10 = vadd.f32 %v1788_v62, %v655_v6 }
 0xe24   :  { %v660_v14 = vsel %vm659_vm11, %v1788_v62, %v656_v10 }
 0xe25   :  { %v665_v17 = vsel %vm662_vm12, %v664_v15, %v660_v14 }
 0xe64   :  { %v670_v16 = vpop.permute.xlu2 %669 }
 0xe65   :  { %v672_v18 = vmul.f32 %v670_v16, %v665_v17 }
 0xe67   :  { %674 = vrot.lane.b32.xlu0 %v672_v18, %s1988_s28 }
 0xed9   :  { %v675_v19 = vpop.permute.xlu0 %674 }
 0xeda   :  { %v677_v20 = vadd.f32 %v675_v19, %v623_v2 }
 0xedc   :  { %1789 = vtanh.f32 %v677_v20 }
 0xee2   :  { %v1790_v21 = vpop.eup %1789 }
 0xee3   :  { %v679_v22 = vsub.f32 %v593_v55, %v1790_v21 }
 0xee5   :  { %681 = vrot.lane.b32.xlu1 %v679_v22, %s1990_s30 }
 0xeed   :  { %967 = vrot.lane.b32.xlu1 %v1753_v29, %s1988_s28 }
 0xf57   :  { %v682_v23 = vpop.permute.xlu1 %681 }
 0xf58   :  { %v684_v24 = vmul.f32 %v682_v23, %v665_v17 }
 0xf5a   :  { %686 = vrot.lane.b32.xlu2 %v684_v24, %s1984_s29 }
 0xf5f   :  { %v2296_v34 = vpop.permute.xlu1 %967 }
 0xfb4   :  { %v687_v1 = vpop.permute.xlu2 %686 }
 0xfb5   :  { %v2258_v3 = vadd.f32 %v1790_v21, %v687_v1 }
 0xfb7   :  { %691 = vrot.lane.b32.xlu0 %v2258_v3, %s1988_s28 }
0x1029   :  { %v692_v30 = vpop.permute.xlu0 %691 }
0x102a   :  { %695 = vst.msk [vmem:[#allocation2 + $0xa] sm:$0x3] %vm214_vm5, %v692_v30  ;;  %1709 = vmatmul.msk.f32.vlgmr.msrb.gmra.mxu2 %vm138_vm6, %v692_v30 }
0x102b   :  { %1126 = vmatpush.msrb.mxu2 %v2262_v25 }
0x102d   :  { %1127 = vmatpush.msrb.mxu2 %v2264_v26 }
0x102f   :  { %1128 = vmatpush.msrb.mxu2 %v2268_v27 }
0x1031   :  { %v1361_v31 = vld [vmem:[#allocation2 + $0xa] sm:$0x3]  ;;  %1129 = vmatpush.msrb.mxu2 %v2272_v28 }
0x1032   :  { %941 = vmatmul.f32.vlgmr.msra.gmra.mxu2 %v1989_v8  ;;  %1728 = vmatmul.msk.f32.vlgmr.msra.gmra.mxu1 %vm138_vm6, %v1361_v31 }
0x1033   :  { %1310 = vmatpush.msra.mxu2 %v2262_v25 }
0x1035   :  { %1311 = vmatpush.msra.mxu2 %v2264_v26 }
0x1037   :  { %1312 = vmatpush.msra.mxu2 %v2268_v27 }
0x1039   :  { %1313 = vmatpush.msra.mxu2 %v2272_v28 }
0x10ad   :  { %v740_v32 = vpop.f32.mrf.mxu2 }
0x10ae   :  { %v763_v33 = vadd.f32 %v740_v32, %v2124_v9  ;;  %v743_v36 = vadd.f32 %v740_v32, %v719_v44 }
0x10b0   :  { %765 = vrot.lane.b32.xlu2 %v763_v33, %s1988_s28  ;;  %v1710_v45 = vmul.f32 -1.442695, %v743_v36 }
0x10b2   :  { %1791 = vpow2.f32 %v1710_v45 }
0x10b5   :  { %v942_v35 = vpop.f32.mrf.mxu2 }
0x10b6   :  { %v970_v8 = vadd.f32 %v2296_v34, %v942_v35  ;;  %v945_v47 = vadd.f32 %v942_v35, %v923_v41 }
0x10b8   :  { %972 = vrot.lane.b32.xlu0 %v970_v8, %s1988_s28  ;;  %v1792_v37 = vpop.eup %1791  ;;  %v1715_v49 = vmul.f32 -1.442695, %v945_v47 }
0x10b9   :  { %v747_v46 = vadd.f32 1.0, %v1792_v37 }
0x10bb   :  { %1793 = vrcp.f32 %v747_v46  ;;  %v759_v51 = vand.u32 2147483648, %v747_v46  ;;  %vm753_vm14 = vweird.f32 %v747_v46  ;;  %v757_v52 = vand.u32 2147483647, %v747_v46 }
0x10bc   :  { %1795 = vpow2.f32 %v1715_v49 }
0x10bd   :  { %v760_v55 = vor.u32 1.1754944e-38, %v759_v51  ;;  %vm758_vm0 = vcmp.eq.f32.partialorder %v757_v52, 8.507059e+37 }
0x10c1   :  { %v1794_v39 = vpop.eup %1793 }
0x10c2   :  { %v749_v42 = vmul.f32 %v1794_v39, %v747_v46  ;;  %vm754_vm13 = vweird.f32 %v1794_v39  ;;  %v1796_v53 = vpop.eup %1795 }
0x10c3   :  { %vm755_vm15 = vmor %vm753_vm14, %vm754_vm13  ;;  %v949_v56 = vadd.f32 1.0, %v1796_v53 }
0x10c4   :  { %v750_v48 = vsub.f32 1.0, %v749_v42 }
0x10c5   :  { %1797 = vrcp.f32 %v949_v56  ;;  %v961_v61 = vand.u32 2147483648, %v949_v56  ;;  %vm955_vm2 = vweird.f32 %v949_v56  ;;  %v959_v62 = vand.u32 2147483647, %v949_v56 }
0x10c6   :  { %v751_v12 = vmul.f32 %v1794_v39, %v750_v48 }
0x10c7   :  { %v962_v4 = vor.u32 1.1754944e-38, %v961_v61  ;;  %vm960_vm4 = vcmp.eq.f32.partialorder %v959_v62, 8.507059e+37 }
0x10c8   :  { %v752_v50 = vadd.f32 %v1794_v39, %v751_v12 }
0x10ca   :  { %v756_v54 = vsel %vm755_vm15, %v1794_v39, %v752_v50 }
0x10cb   :  { %v761_v58 = vsel %vm758_vm0, %v760_v55, %v756_v54  ;;  %v1798_v0 = vpop.eup %1797 }
0x10cc   :  { %v951_v2 = vmul.f32 %v1798_v0, %v949_v56  ;;  %vm956_vm1 = vweird.f32 %v1798_v0 }
0x10cd   :  { %vm957_vm3 = vmor %vm955_vm2, %vm956_vm1 }
0x10ce   :  { %v952_v5 = vsub.f32 1.0, %v951_v2 }
0x10d0   :  { %v953_v60 = vmul.f32 %v1798_v0, %v952_v5 }
0x10d2   :  { %v954_v7 = vadd.f32 %v1798_v0, %v953_v60 }
0x10d4   :  { %v958_v63 = vsel %vm957_vm3, %v1798_v0, %v954_v7 }
0x10d5   :  { %v963_v10 = vsel %vm960_vm4, %v962_v4, %v958_v63  ;;  %v1106_v63 = vpop.f32.mrf.mxu0 }
0x10d6   :  { %v1107_v4 = vadd.f32 %v2304_v38, %v1106_v63 }
0x10dd   :  { %v1290_v63 = vpop.f32.mrf.mxu0 }
0x110a   :  { %v766_v57 = vpop.permute.xlu2 %765 }
0x110b   :  { %v768_v59 = vmul.f32 %v766_v57, %v761_v58 }
0x110d   :  { %770 = vrot.lane.b32.xlu1 %v768_v59, %s1988_s28 }
0x112a   :  { %v973_v6 = vpop.permute.xlu0 %972 }
0x112b   :  { %v975_v11 = vmul.f32 %v973_v6, %v963_v10 }
0x112d   :  { %977 = vrot.lane.b32.xlu2 %v975_v11, %s1988_s28 }
0x117f   :  { %v771_v13 = vpop.permute.xlu1 %770 }
0x1180   :  { %v773_v14 = vadd.f32 %v771_v13, %v719_v44  ;;  %v2335_v44 = vpop.f32.mrf.mxu1 }
0x1182   :  { %1799 = vtanh.f32 %v773_v14 }
0x1187   :  { %v978_v15 = vpop.permute.xlu2 %977 }
0x1188   :  { %v1800_v16 = vpop.eup %1799  ;;  %v980_v17 = vadd.f32 %v978_v15, %v923_v41  ;;  %v1014_v36 = vpop.f32.mrf.mxu1 }
0x1189   :  { %v775_v18 = vsub.f32 %v2258_v3, %v1800_v16  ;;  %v1015_v45 = vadd.f32 %v2304_v38, %v1014_v36 }
0x118a   :  { %1801 = vtanh.f32 %v980_v17 }
0x118b   :  { %777 = vrot.lane.b32.xlu0 %v775_v18, %s1990_s30 }
0x1190   :  { %v1802_v19 = vpop.eup %1801 }
0x1191   :  { %v982_v20 = vsub.f32 0.0, %v1802_v19 }
0x1193   :  { %984 = vrot.lane.b32.xlu1 %v982_v20, %s1990_s30 }
0x11fd   :  { %v778_v21 = vpop.permute.xlu0 %777 }
0x11fe   :  { %v780_v22 = vmul.f32 %v778_v21, %v761_v58 }
0x1200   :  { %782 = vrot.lane.b32.xlu2 %v780_v22, %s1984_s29 }
0x1205   :  { %v985_v23 = vpop.permute.xlu1 %984 }
0x1206   :  { %v987_v24 = vmul.f32 %v985_v23, %v963_v10 }
0x1208   :  { %989 = vrot.lane.b32.xlu0 %v987_v24, %s1984_s29 }
0x125a   :  { %v783_v1 = vpop.permute.xlu2 %782 }
0x125b   :  { %v2314_v29 = vadd.f32 %v1800_v16, %v783_v1 }
0x125d   :  { %787 = vrot.lane.b32.xlu1 %v2314_v29, %s1988_s28 }
0x127a   :  { %v990_v3 = vpop.permute.xlu0 %989 }
0x127b   :  { %v992_v30 = vadd.f32 %v1802_v19, %v990_v3 }
0x127d   :  { %1018 = vrot.lane.b32.xlu2 %v992_v30, %s1988_s28 }
0x12cf   :  { %v788_v31 = vpop.permute.xlu1 %787 }
0x12d0   :  { %791 = vst.msk [vmem:[#allocation2 + $0xc] sm:$0x3] %vm214_vm5, %v788_v31  ;;  %1712 = vmatmul.msk.f32.vlgmr.msrb.gmra.mxu3 %vm138_vm6, %v788_v31 }
0x12d1   :  { %1218 = vmatpush.msrb.mxu3 %v2262_v25 }
0x12d3   :  { %1219 = vmatpush.msrb.mxu3 %v2264_v26 }
0x12d5   :  { %1220 = vmatpush.msrb.mxu3 %v2268_v27 }
0x12d7   :  { %v1019_v32 = vpop.permute.xlu2 %1018  ;;  %v1453_v33 = vld [vmem:[#allocation2 + $0xc] sm:$0x3]  ;;  %1221 = vmatpush.msrb.mxu3 %v2272_v28 }
0x12d8   :  { %1717 = vmatmul.msk.f32.vlgmr.msra.gmra.mxu3 %vm138_vm6, %v1019_v32  ;;  %1731 = vmatmul.msk.f32.vlgmr.msrb.gmra.mxu0 %vm138_vm6, %v1453_v33 }
0x12d9   :  { %1402 = vmatpush.msra.mxu3 %v2262_v25 }
0x12db   :  { %1403 = vmatpush.msra.mxu3 %v2264_v26 }
0x12dd   :  { %1404 = vmatpush.msra.mxu3 %v2268_v27 }
0x12df   :  { %1405 = vmatpush.msra.mxu3 %v2272_v28 }
0x1353   :  { %v2331_v35 = vpop.f32.mrf.mxu3 }
0x135b   :  { %v1039_v8 = vpop.f32.mrf.mxu3 }
0x135c   :  { %v1062_v43 = vadd.f32 %v1039_v8, %v2296_v34  ;;  %v1042_v37 = vadd.f32 %v1039_v8, %v1015_v45 }
0x135e   :  { %1064 = vrot.lane.b32.xlu0 %v1062_v43, %s1988_s28  ;;  %v1718_v46 = vmul.f32 -1.442695, %v1042_v37 }
0x1360   :  { %1803 = vpow2.f32 %v1718_v46 }
0x1366   :  { %v1804_v39 = vpop.eup %1803 }
0x1367   :  { %v1046_v40 = vadd.f32 1.0, %v1804_v39  ;;  %v1198_v39 = vpop.f32.mrf.mxu1 }
0x1369   :  { %1805 = vrcp.f32 %v1046_v40  ;;  %v1058_v12 = vand.u32 2147483648, %v1046_v40  ;;  %vm1052_vm8 = vweird.f32 %v1046_v40  ;;  %v1056_v50 = vand.u32 2147483647, %v1046_v40 }
0x136b   :  { %v1059_v52 = vor.u32 1.1754944e-38, %v1058_v12  ;;  %vm1057_vm10 = vcmp.eq.f32.partialorder %v1056_v50, 8.507059e+37 }
0x136f   :  { %v1806_v41 = vpop.eup %1805 }
0x1370   :  { %v1048_v42 = vmul.f32 %v1806_v41, %v1046_v40  ;;  %vm1053_vm7 = vweird.f32 %v1806_v41  ;;  %v1199_v40 = vadd.f32 %v2304_v38, %v1198_v39  ;;  %v1382_v39 = vpop.f32.mrf.mxu1 }
0x1371   :  { %vm1054_vm9 = vmor %vm1052_vm8, %vm1053_vm7 }
0x1372   :  { %v1049_v47 = vsub.f32 1.0, %v1048_v42 }
0x1374   :  { %v1050_v48 = vmul.f32 %v1806_v41, %v1049_v47 }
0x1376   :  { %v1051_v49 = vadd.f32 %v1806_v41, %v1050_v48 }
0x1378   :  { %v1055_v51 = vsel %vm1054_vm9, %v1806_v41, %v1051_v49 }
0x1379   :  { %v1060_v54 = vsel %vm1057_vm10, %v1059_v52, %v1055_v51 }
0x13d0   :  { %v1065_v53 = vpop.permute.xlu0 %1064 }
0x13d1   :  { %v1067_v55 = vmul.f32 %v1065_v53, %v1060_v54 }
0x13d3   :  { %1069 = vrot.lane.b32.xlu1 %v1067_v55, %s1988_s28 }
0x1445   :  { %v1070_v56 = vpop.permute.xlu1 %1069 }
0x1446   :  { %v1072_v57 = vadd.f32 %v1070_v56, %v1015_v45 }
0x1448   :  { %1807 = vtanh.f32 %v1072_v57 }
0x144e   :  { %v1808_v58 = vpop.eup %1807 }
0x144f   :  { %v1074_v59 = vsub.f32 %v992_v30, %v1808_v58 }
0x1451   :  { %1076 = vrot.lane.b32.xlu2 %v1074_v59, %s1990_s30 }
0x14ab   :  { %v1077_v0 = vpop.permute.xlu2 %1076 }
0x14ac   :  { %v1079_v2 = vmul.f32 %v1077_v0, %v1060_v54 }
0x14ae   :  { %1081 = vrot.lane.b32.xlu0 %v1079_v2, %s1984_s29 }
0x1520   :  { %v1082_v5 = vpop.permute.xlu0 %1081 }
0x1521   :  { %v1084_v60 = vadd.f32 %v1808_v58, %v1082_v5 }
0x1523   :  { %1110 = vrot.lane.b32.xlu1 %v1084_v60, %s1988_s28 }
0x1595   :  { %v1111_v7 = vpop.permute.xlu1 %1110 }
0x1596   :  { %1720 = vmatmul.msk.f32.vlgmr.msrb.gmra.mxu2 %vm138_vm6, %v1111_v7 }
0x1597   :  { %1494 = vmatpush.msrb.mxu2 %v2262_v25 }
0x1599   :  { %1495 = vmatpush.msrb.mxu2 %v2264_v26 }
0x159b   :  { %1496 = vmatpush.msrb.mxu2 %v2268_v27 }
0x159d   :  { %1497 = vmatpush.msrb.mxu2 %v2272_v28 }
0x1619   :  { %v1131_v61 = vpop.f32.mrf.mxu2 }
0x161a   :  { %v1154_v62 = vadd.f32 %v1131_v61, %v2296_v34  ;;  %v1134_v6 = vadd.f32 %v1131_v61, %v1107_v4 }
0x161c   :  { %1156 = vrot.lane.b32.xlu2 %v1154_v62, %s1988_s28  ;;  %v1721_v10 = vmul.f32 -1.442695, %v1134_v6 }
0x161e   :  { %1809 = vpow2.f32 %v1721_v10 }
0x1624   :  { %v1810_v11 = vpop.eup %1809 }
0x1625   :  { %v1138_v13 = vadd.f32 1.0, %v1810_v11 }
0x1627   :  { %1811 = vrcp.f32 %v1138_v13  ;;  %v1150_v19 = vand.u32 2147483648, %v1138_v13  ;;  %vm1144_vm12 = vweird.f32 %v1138_v13  ;;  %v1148_v20 = vand.u32 2147483647, %v1138_v13 }
0x1629   :  { %v1151_v22 = vor.u32 1.1754944e-38, %v1150_v19  ;;  %vm1149_vm14 = vcmp.eq.f32.partialorder %v1148_v20, 8.507059e+37 }
0x162d   :  { %v1812_v14 = vpop.eup %1811 }
0x162e   :  { %v1140_v15 = vmul.f32 %v1812_v14, %v1138_v13  ;;  %vm1145_vm11 = vweird.f32 %v1812_v14 }
0x162f   :  { %vm1146_vm13 = vmor %vm1144_vm12, %vm1145_vm11 }
0x1630   :  { %v1141_v16 = vsub.f32 1.0, %v1140_v15 }
0x1632   :  { %v1142_v17 = vmul.f32 %v1812_v14, %v1141_v16 }
0x1634   :  { %v1143_v18 = vadd.f32 %v1812_v14, %v1142_v17 }
0x1636   :  { %v1147_v21 = vsel %vm1146_vm13, %v1812_v14, %v1143_v18 }
0x1637   :  { %v1152_v24 = vsel %vm1149_vm14, %v1151_v22, %v1147_v21 }
0x1676   :  { %v1157_v23 = vpop.permute.xlu2 %1156 }
0x1677   :  { %v1159_v1 = vmul.f32 %v1157_v23, %v1152_v24 }
0x1679   :  { %1161 = vrot.lane.b32.xlu0 %v1159_v1, %s1988_s28 }
0x16eb   :  { %v1162_v3 = vpop.permute.xlu0 %1161 }
0x16ec   :  { %v1164_v30 = vadd.f32 %v1162_v3, %v1107_v4  ;;  %v1291_v4 = vadd.f32 %v2304_v38, %v1290_v63 }
0x16ee   :  { %1813 = vtanh.f32 %v1164_v30 }
0x16f4   :  { %v1814_v31 = vpop.eup %1813 }
0x16f5   :  { %v1166_v32 = vsub.f32 %v1084_v60, %v1814_v31 }
0x16f7   :  { %1168 = vrot.lane.b32.xlu1 %v1166_v32, %s1990_s30 }
0x1769   :  { %v1169_v33 = vpop.permute.xlu1 %1168 }
0x176a   :  { %v1171_v8 = vmul.f32 %v1169_v33, %v1152_v24 }
0x176c   :  { %1173 = vrot.lane.b32.xlu2 %v1171_v8, %s1984_s29 }
0x17c6   :  { %v1174_v43 = vpop.permute.xlu2 %1173 }
0x17c7   :  { %v1176_v36 = vadd.f32 %v1814_v31, %v1174_v43 }
0x17c9   :  { %1202 = vrot.lane.b32.xlu0 %v1176_v36, %s1988_s28 }
0x183b   :  { %v1203_v45 = vpop.permute.xlu0 %1202 }
0x183c   :  { %1723 = vmatmul.msk.f32.vlgmr.msrb.gmra.mxu3 %vm138_vm6, %v1203_v45 }
0x183d   :  { %1586 = vmatpush.msrb.mxu3 %v2262_v25 }
0x183f   :  { %1587 = vmatpush.msrb.mxu3 %v2264_v26 }
0x1841   :  { %1588 = vmatpush.msrb.mxu3 %v2268_v27 }
0x1843   :  { %1589 = vmatpush.msrb.mxu3 %v2272_v28 }
0x18bf   :  { %v1223_v37 = vpop.f32.mrf.mxu3 }
0x18c0   :  { %v1246_v46 = vadd.f32 %v1223_v37, %v2296_v34  ;;  %v1226_v41 = vadd.f32 %v1223_v37, %v1199_v40 }
0x18c2   :  { %1248 = vrot.lane.b32.xlu1 %v1246_v46, %s1988_s28  ;;  %v1724_v42 = vmul.f32 -1.442695, %v1226_v41 }
0x18c4   :  { %1815 = vpow2.f32 %v1724_v42 }
0x18ca   :  { %v1816_v47 = vpop.eup %1815 }
0x18cb   :  { %v1230_v48 = vadd.f32 1.0, %v1816_v47 }
0x18cd   :  { %1817 = vrcp.f32 %v1230_v48  ;;  %v1242_v28 = vand.u32 2147483648, %v1230_v48  ;;  %vm1236_vm0 = vweird.f32 %v1230_v48  ;;  %v1240_v50 = vand.u32 2147483647, %v1230_v48 }
0x18cf   :  { %v1243_v52 = vor.u32 1.1754944e-38, %v1242_v28  ;;  %vm1241_vm2 = vcmp.eq.f32.partialorder %v1240_v50, 8.507059e+37 }
0x18d3   :  { %v1818_v25 = vpop.eup %1817 }
0x18d4   :  { %v1232_v26 = vmul.f32 %v1818_v25, %v1230_v48  ;;  %vm1237_vm15 = vweird.f32 %v1818_v25 }
0x18d5   :  { %vm1238_vm1 = vmor %vm1236_vm0, %vm1237_vm15 }
0x18d6   :  { %v1233_v49 = vsub.f32 1.0, %v1232_v26 }
0x18d8   :  { %v1234_v27 = vmul.f32 %v1818_v25, %v1233_v49 }
0x18da   :  { %v1235_v12 = vadd.f32 %v1818_v25, %v1234_v27 }
0x18dc   :  { %v1239_v51 = vsel %vm1238_vm1, %v1818_v25, %v1235_v12 }
0x18dd   :  { %v1244_v54 = vsel %vm1241_vm2, %v1243_v52, %v1239_v51 }
0x1934   :  { %v1249_v53 = vpop.permute.xlu1 %1248 }
0x1935   :  { %v1251_v55 = vmul.f32 %v1249_v53, %v1244_v54 }
0x1937   :  { %1253 = vrot.lane.b32.xlu2 %v1251_v55, %s1988_s28 }
0x1991   :  { %v1254_v56 = vpop.permute.xlu2 %1253 }
0x1992   :  { %v1256_v57 = vadd.f32 %v1254_v56, %v1199_v40  ;;  %v1383_v40 = vadd.f32 %v2304_v38, %v1382_v39 }
0x1994   :  { %1819 = vtanh.f32 %v1256_v57 }
0x199a   :  { %v1820_v58 = vpop.eup %1819 }
0x199b   :  { %v1258_v59 = vsub.f32 %v1176_v36, %v1820_v58 }
0x199d   :  { %1260 = vrot.lane.b32.xlu0 %v1258_v59, %s1990_s30 }
0x1a0f   :  { %v1261_v0 = vpop.permute.xlu0 %1260 }
0x1a10   :  { %v1263_v2 = vmul.f32 %v1261_v0, %v1244_v54 }
0x1a12   :  { %1265 = vrot.lane.b32.xlu1 %v1263_v2, %s1984_s29 }
0x1a84   :  { %v1266_v5 = vpop.permute.xlu1 %1265 }
0x1a85   :  { %v1268_v60 = vadd.f32 %v1820_v58, %v1266_v5  ;;  %v859_v5 = vadd.f32 %v2331_v35, %v2124_v9 }
0x1a87   :  { %1294 = vrot.lane.b32.xlu2 %v1268_v60, %s1988_s28 }
0x1ae1   :  { %v1295_v7 = vpop.permute.xlu2 %1294 }
0x1ae2   :  { %1726 = vmatmul.msk.f32.vlgmr.msra.gmra.mxu2 %vm138_vm6, %v1295_v7 }
0x1b65   :  { %v1315_v61 = vpop.f32.mrf.mxu2 }
0x1b66   :  { %v1338_v62 = vadd.f32 %v1315_v61, %v2296_v34  ;;  %v1318_v6 = vadd.f32 %v1315_v61, %v1291_v4 }
0x1b68   :  { %1340 = vrot.lane.b32.xlu0 %v1338_v62, %s1988_s28  ;;  %v1727_v10 = vmul.f32 -1.442695, %v1318_v6  ;;  %v1851_v62 = vld [vmem:[%s2439_s3] ss:$0 sm:$0xff] }
0x1b69   :  { %v815_v63 = vadd.f32 %v1851_v62, %v2335_v44 }
0x1b6a   :  { %1821 = vpow2.f32 %v1727_v10 }
0x1b70   :  { %v1822_v11 = vpop.eup %1821 }
0x1b71   :  { %v1322_v13 = vadd.f32 1.0, %v1822_v11 }
0x1b73   :  { %1823 = vrcp.f32 %v1322_v13  ;;  %v1334_v19 = vand.u32 2147483648, %v1322_v13  ;;  %vm1328_vm4 = vweird.f32 %v1322_v13  ;;  %v1332_v20 = vand.u32 2147483647, %v1322_v13 }
0x1b75   :  { %v1335_v22 = vor.u32 1.1754944e-38, %v1334_v19  ;;  %vm1333_vm8 = vcmp.eq.f32.partialorder %v1332_v20, 8.507059e+37 }
0x1b79   :  { %v1824_v14 = vpop.eup %1823 }
0x1b7a   :  { %v1324_v15 = vmul.f32 %v1824_v14, %v1322_v13  ;;  %vm1329_vm3 = vweird.f32 %v1824_v14 }
0x1b7b   :  { %vm1330_vm7 = vmor %vm1328_vm4, %vm1329_vm3 }
0x1b7c   :  { %v1325_v16 = vsub.f32 1.0, %v1324_v15 }
0x1b7e   :  { %v1326_v17 = vmul.f32 %v1824_v14, %v1325_v16 }
0x1b80   :  { %v1327_v18 = vadd.f32 %v1824_v14, %v1326_v17 }
0x1b82   :  { %v1331_v21 = vsel %vm1330_vm7, %v1824_v14, %v1327_v18 }
0x1b83   :  { %v1336_v24 = vsel %vm1333_vm8, %v1335_v22, %v1331_v21 }
0x1bda   :  { %v1341_v23 = vpop.permute.xlu0 %1340 }
0x1bdb   :  { %v1343_v1 = vmul.f32 %v1341_v23, %v1336_v24 }
0x1bdd   :  { %1345 = vrot.lane.b32.xlu1 %v1343_v1, %s1988_s28 }
0x1c4f   :  { %v1346_v3 = vpop.permute.xlu1 %1345 }
0x1c50   :  { %v1348_v30 = vadd.f32 %v1346_v3, %v1291_v4  ;;  %v839_v4 = vadd.f32 %v2331_v35, %v815_v63 }
0x1c52   :  { %1825 = vtanh.f32 %v1348_v30  ;;  %v1713_v9 = vmul.f32 -1.442695, %v839_v4 }
0x1c58   :  { %v1826_v31 = vpop.eup %1825 }
0x1c59   :  { %v1350_v32 = vsub.f32 %v1268_v60, %v1826_v31 }
0x1c5b   :  { %1352 = vrot.lane.b32.xlu2 %v1350_v32, %s1990_s30 }
0x1cb5   :  { %v1353_v33 = vpop.permute.xlu2 %1352 }
0x1cb6   :  { %v1355_v8 = vmul.f32 %v1353_v33, %v1336_v24  ;;  %v1474_v24 = vpop.f32.mrf.mxu0 }
0x1cb7   :  { %v1475_v1 = vadd.f32 %v2304_v38, %v1474_v24  ;;  %v1639_v24 = vld [vmem:[%s2445_s9 + $0x10] sm:$0xff] }
0x1cb8   :  { %1357 = vrot.lane.b32.xlu0 %v1355_v8, %s1984_s29 }
0x1d2a   :  { %v1358_v43 = vpop.permute.xlu0 %1357 }
0x1d2b   :  { %v1360_v36 = vadd.f32 %v1826_v31, %v1358_v43 }
0x1d2d   :  { %1386 = vrot.lane.b32.xlu1 %v1360_v36, %s1988_s28 }
0x1d9f   :  { %v1387_v45 = vpop.permute.xlu1 %1386 }
0x1da0   :  { %1729 = vmatmul.msk.f32.vlgmr.msra.gmra.mxu3 %vm138_vm6, %v1387_v45 }
0x1e23   :  { %v1407_v37 = vpop.f32.mrf.mxu3 }
0x1e24   :  { %v1430_v46 = vadd.f32 %v1407_v37, %v2296_v34  ;;  %v1410_v41 = vadd.f32 %v1407_v37, %v1383_v40 }
0x1e26   :  { %1432 = vrot.lane.b32.xlu2 %v1430_v46, %s1988_s28  ;;  %v1730_v42 = vmul.f32 -1.442695, %v1410_v41 }
0x1e28   :  { %1827 = vpow2.f32 %v1730_v42 }
0x1e2e   :  { %v1828_v47 = vpop.eup %1827 }
0x1e2f   :  { %v1414_v48 = vadd.f32 1.0, %v1828_v47 }
0x1e31   :  { %1829 = vrcp.f32 %v1414_v48  ;;  %v1426_v28 = vand.u32 2147483648, %v1414_v48  ;;  %vm1420_vm10 = vweird.f32 %v1414_v48  ;;  %v1424_v50 = vand.u32 2147483647, %v1414_v48 }
0x1e33   :  { %v1427_v52 = vor.u32 1.1754944e-38, %v1426_v28  ;;  %vm1425_vm12 = vcmp.eq.f32.partialorder %v1424_v50, 8.507059e+37 }
0x1e37   :  { %v1830_v25 = vpop.eup %1829 }
0x1e38   :  { %v1416_v26 = vmul.f32 %v1830_v25, %v1414_v48  ;;  %vm1421_vm9 = vweird.f32 %v1830_v25 }
0x1e39   :  { %vm1422_vm11 = vmor %vm1420_vm10, %vm1421_vm9  ;;  %vm1670_vm10 = vcmask 58368  }
0x1e3a   :  { %v1417_v49 = vsub.f32 1.0, %v1416_v26 }
0x1e3c   :  { %v1418_v27 = vmul.f32 %v1830_v25, %v1417_v49 }
0x1e3e   :  { %v1419_v12 = vadd.f32 %v1830_v25, %v1418_v27 }
0x1e40   :  { %v1423_v51 = vsel %vm1422_vm11, %v1830_v25, %v1419_v12 }
0x1e41   :  { %v1428_v54 = vsel %vm1425_vm12, %v1427_v52, %v1423_v51 }
0x1e80   :  { %v1433_v53 = vpop.permute.xlu2 %1432 }
0x1e81   :  { %v1435_v55 = vmul.f32 %v1433_v53, %v1428_v54 }
0x1e83   :  { %1437 = vrot.lane.b32.xlu0 %v1435_v55, %s1988_s28 }
0x1ef5   :  { %v1438_v56 = vpop.permute.xlu0 %1437 }
0x1ef6   :  { %v1440_v57 = vadd.f32 %v1438_v56, %v1383_v40 }
0x1ef8   :  { %1831 = vtanh.f32 %v1440_v57 }
0x1ef9   :  { %1833 = vpow2.f32 %v1713_v9 }
0x1efe   :  { %v1832_v58 = vpop.eup %1831 }
0x1eff   :  { %v1442_v59 = vsub.f32 %v1360_v36, %v1832_v58  ;;  %v1834_v6 = vpop.eup %1833 }
0x1f00   :  { %v843_v10 = vadd.f32 1.0, %v1834_v6 }
0x1f01   :  { %1444 = vrot.lane.b32.xlu1 %v1442_v59, %s1990_s30 }
0x1f02   :  { %1835 = vrcp.f32 %v843_v10  ;;  %v855_v19 = vand.u32 2147483648, %v843_v10  ;;  %vm849_vm14 = vweird.f32 %v843_v10  ;;  %v853_v20 = vand.u32 2147483647, %v843_v10 }
0x1f04   :  { %v856_v44 = vor.u32 1.1754944e-38, %v855_v19  ;;  %vm854_vm0 = vcmp.eq.f32.partialorder %v853_v20, 8.507059e+37 }
0x1f08   :  { %v1836_v11 = vpop.eup %1835 }
0x1f09   :  { %v845_v13 = vmul.f32 %v1836_v11, %v843_v10  ;;  %vm850_vm13 = vweird.f32 %v1836_v11 }
0x1f0a   :  { %vm851_vm15 = vmor %vm849_vm14, %vm850_vm13 }
0x1f0b   :  { %v846_v14 = vsub.f32 1.0, %v845_v13 }
0x1f0d   :  { %v847_v15 = vmul.f32 %v1836_v11, %v846_v14 }
0x1f0f   :  { %v848_v17 = vadd.f32 %v1836_v11, %v847_v15 }
0x1f11   :  { %v852_v35 = vsel %vm851_vm15, %v1836_v11, %v848_v17 }
0x1f12   :  { %v857_v22 = vsel %vm854_vm0, %v856_v44, %v852_v35 }
0x1f73   :  { %v1445_v0 = vpop.permute.xlu1 %1444 }
0x1f74   :  { %v1447_v2 = vmul.f32 %v1445_v0, %v1428_v54 }
0x1f76   :  { %1449 = vrot.lane.b32.xlu2 %v1447_v2, %s1984_s29 }
0x1f7e   :  { %861 = vrot.lane.b32.xlu2 %v859_v5, %s1988_s28 }
0x1fd0   :  { %v1450_v60 = vpop.permute.xlu2 %1449 }
0x1fd1   :  { %v2384_v7 = vadd.f32 %v1832_v58, %v1450_v60 }
0x1fd3   :  { %1478 = vrot.lane.b32.xlu0 %v2384_v7, %s1988_s28 }
0x1fd8   :  { %v862_v21 = vpop.permute.xlu2 %861 }
0x1fd9   :  { %v864_v23 = vmul.f32 %v862_v21, %v857_v22 }
0x2045   :  { %v1479_v61 = vpop.permute.xlu0 %1478 }
0x2046   :  { %1732 = vmatmul.msk.f32.vlgmr.msrb.gmra.mxu2 %vm138_vm6, %v1479_v61 }
0x20c9   :  { %v1499_v16 = vpop.f32.mrf.mxu2 }
0x20ca   :  { %v1522_v18 = vadd.f32 %v1499_v16, %v2296_v34  ;;  %v1502_v3 = vadd.f32 %v1499_v16, %v1475_v1 }
0x20cc   :  { %1524 = vrot.lane.b32.xlu1 %v1522_v18, %s1988_s28  ;;  %v1733_v30 = vmul.f32 -1.442695, %v1502_v3  ;;  %v1637_v3 = vld [vmem:[%s2445_s9] sm:$0xff] }
0x20ce   :  { %1837 = vpow2.f32 %v1733_v30 }
0x20d4   :  { %866 = vrot.lane.b32.xlu1 %v864_v23, %s1988_s28  ;;  %v1838_v31 = vpop.eup %1837  ;;  %v1640_v23 = vld [vmem:[%s2445_s9 + $0x18] sm:$0xff] }
0x20d5   :  { %v1506_v32 = vadd.f32 1.0, %v1838_v31  ;;  %1662 = vmatpush.msra.mxu0 %v1640_v23 }
0x20d7   :  { %1839 = vrcp.f32 %v1506_v32  ;;  %v1518_v37 = vand.u32 2147483648, %v1506_v32  ;;  %vm1512_vm2 = vweird.f32 %v1506_v32  ;;  %v1516_v46 = vand.u32 2147483647, %v1506_v32  ;;  %1663 = vmatpush.msra.mxu0 %v1639_v24 }
0x20d9   :  { %v1519_v40 = vor.u32 1.1754944e-38, %v1518_v37  ;;  %vm1517_vm4 = vcmp.eq.f32.partialorder %v1516_v46, 8.507059e+37 }
0x20dd   :  { %v1840_v33 = vpop.eup %1839 }
0x20de   :  { %v1508_v8 = vmul.f32 %v1840_v33, %v1506_v32  ;;  %vm1513_vm1 = vweird.f32 %v1840_v33 }
0x20df   :  { %vm1514_vm3 = vmor %vm1512_vm2, %vm1513_vm1 }
0x20e0   :  { %v1509_v43 = vsub.f32 1.0, %v1508_v8 }
0x20e2   :  { %v1510_v36 = vmul.f32 %v1840_v33, %v1509_v43 }
0x20e4   :  { %v1511_v45 = vadd.f32 %v1840_v33, %v1510_v36 }
0x20e6   :  { %v1515_v39 = vsel %vm1514_vm3, %v1840_v33, %v1511_v45  ;;  %v1754_v33 = vld [vmem:[%s2446_s10] ss:$0 sm:$0xff] }
0x20e7   :  { %v1520_v42 = vsel %vm1517_vm4, %v1519_v40, %v1515_v39 }
0x213e   :  { %v1525_v41 = vpop.permute.xlu1 %1524 }
0x213f   :  { %v1527_v47 = vmul.f32 %v1525_v41, %v1520_v42 }
0x2141   :  { %1529 = vrot.lane.b32.xlu0 %v1527_v47, %s1988_s28 }
0x2146   :  { %v867_v48 = vpop.permute.xlu1 %866 }
0x2147   :  { %v869_v25 = vadd.f32 %v867_v48, %v815_v63 }
0x2149   :  { %1841 = vtanh.f32 %v869_v25 }
0x214f   :  { %v1842_v26 = vpop.eup %1841 }
0x2150   :  { %v871_v49 = vsub.f32 %v2314_v29, %v1842_v26 }
0x2152   :  { %873 = vrot.lane.b32.xlu0 %v871_v49, %s1990_s30 }
0x21b3   :  { %v1530_v27 = vpop.permute.xlu0 %1529 }
0x21b4   :  { %v1532_v12 = vadd.f32 %v1530_v27, %v1475_v1  ;;  %v1638_v1 = vld [vmem:[%s2445_s9 + $0x8] sm:$0xff] }
0x21b5   :  { %1664 = vmatpush.msra.mxu0 %v1638_v1 }
0x21b6   :  { %1843 = vtanh.f32 %v1532_v12 }
0x21b7   :  { %1665 = vmatpush.msra.mxu0 %v1637_v3 }
0x21bc   :  { %v1844_v28 = vpop.eup %1843 }
0x21bd   :  { %v1534_v50 = vsub.f32 %v2384_v7, %v1844_v28 }
0x21bf   :  { %1536 = vrot.lane.b32.xlu2 %v1534_v50, %s1990_s30 }
0x21c4   :  { %v874_v51 = vpop.permute.xlu0 %873 }
0x21c5   :  { %v876_v52 = vmul.f32 %v874_v51, %v857_v22 }
0x21c7   :  { %878 = vrot.lane.b32.xlu2 %v876_v52, %s1984_s29 }
0x2219   :  { %v1537_v53 = vpop.permute.xlu2 %1536 }
0x221a   :  { %v1539_v54 = vmul.f32 %v1537_v53, %v1520_v42 }
0x221c   :  { %1541 = vrot.lane.b32.xlu1 %v1539_v54, %s1984_s29 }
0x2221   :  { %v879_v55 = vpop.permute.xlu2 %878 }
0x2222   :  { %v881_v29 = vadd.f32 %v1842_v26, %v879_v55 }
0x2224   :  { %883 = vrot.lane.b32.xlu1 %v881_v29, %s1988_s28 }
0x228e   :  { %v1542_v56 = vpop.permute.xlu1 %1541 }
0x228f   :  { %v1544_v57 = vadd.f32 %v1844_v28, %v1542_v56 }
0x2291   :  { %1570 = vrot.lane.b32.xlu0 %v1544_v57, %s1988_s28 }
0x2296   :  { %v884_v58 = vpop.permute.xlu1 %883 }
0x2297   :  { %887 = vst.msk [vmem:[#allocation2 + $0xe] sm:$0x3] %vm214_vm5, %v884_v58 }
0x229e   :  { %v1545_v59 = vld [vmem:[#allocation2 + $0xe] sm:$0x3] }
0x229f   :  { %1734 = vmatmul.msk.f32.vlgmr.msrb.gmra.mxu1 %vm138_vm6, %v1545_v59 }
0x2303   :  { %v1571_v0 = vpop.permute.xlu0 %1570 }
0x2304   :  { %1735 = vmatmul.msk.f32.vlgmr.msrb.gmra.mxu3 %vm138_vm6, %v1571_v0 }
0x231c   :  { %v1566_v60 = vpop.f32.mrf.mxu1 }
0x231d   :  { %v1567_v7 = vadd.f32 %v2304_v38, %v1566_v60 }
0x2387   :  { %v1591_v2 = vpop.f32.mrf.mxu3 }
0x2388   :  { %v1614_v5 = vadd.f32 %v1591_v2, %v2296_v34  ;;  %v1594_v61 = vadd.f32 %v1591_v2, %v1567_v7 }
0x238a   :  { %1616 = vrot.lane.b32.xlu2 %v1614_v5, %s1988_s28  ;;  %v1736_v62 = vmul.f32 -1.442695, %v1594_v61 }
0x238c   :  { %1845 = vpow2.f32 %v1736_v62 }
0x2392   :  { %v1846_v63 = vpop.eup %1845 }
0x2393   :  { %v1598_v4 = vadd.f32 1.0, %v1846_v63 }
0x2395   :  { %1847 = vrcp.f32 %v1598_v4  ;;  %v1610_v14 = vand.u32 2147483648, %v1598_v4  ;;  %vm1604_vm7 = vweird.f32 %v1598_v4  ;;  %v1608_v34 = vand.u32 2147483647, %v1598_v4 }
0x2397   :  { %v1611_v16 = vor.u32 1.1754944e-38, %v1610_v14  ;;  %vm1609_vm9 = vcmp.eq.f32.partialorder %v1608_v34, 8.507059e+37 }
0x239b   :  { %v1848_v9 = vpop.eup %1847 }
0x239c   :  { %v1600_v6 = vmul.f32 %v1848_v9, %v1598_v4  ;;  %vm1605_vm5 = vweird.f32 %v1848_v9 }
0x239d   :  { %vm1606_vm8 = vmor %vm1604_vm7, %vm1605_vm5 }
0x239e   :  { %v1601_v10 = vsub.f32 1.0, %v1600_v6 }
0x23a0   :  { %v1602_v11 = vmul.f32 %v1848_v9, %v1601_v10 }
0x23a2   :  { %v1603_v13 = vadd.f32 %v1848_v9, %v1602_v11 }
0x23a4   :  { %v1607_v15 = vsel %vm1606_vm8, %v1848_v9, %v1603_v13 }
0x23a5   :  { %v1612_v38 = vsel %vm1609_vm9, %v1611_v16, %v1607_v15 }
0x23e4   :  { %v1617_v17 = vpop.permute.xlu2 %1616 }
0x23e5   :  { %v1619_v18 = vmul.f32 %v1617_v17, %v1612_v38 }
0x23e7   :  { %1621 = vrot.lane.b32.xlu0 %v1619_v18, %s1988_s28 }
0x2459   :  { %v1622_v19 = vpop.permute.xlu0 %1621 }
0x245a   :  { %v1624_v20 = vadd.f32 %v1622_v19, %v1567_v7 }
0x245c   :  { %1849 = vtanh.f32 %v1624_v20 }
0x2462   :  { %v1850_v35 = vpop.eup %1849 }
0x2463   :  { %v1626_v44 = vsub.f32 %v1544_v57, %v1850_v35 }
0x2465   :  { %1628 = vrot.lane.b32.xlu1 %v1626_v44, %s1990_s30 }
0x24d7   :  { %v1629_v21 = vpop.permute.xlu1 %1628 }
0x24d8   :  { %v1631_v22 = vmul.f32 %v1629_v21, %v1612_v38 }
0x24da   :  { %1633 = vrot.lane.b32.xlu2 %v1631_v22, %s1984_s29 }
0x2534   :  { %v1634_v30 = vpop.permute.xlu2 %1633 }
0x2535   :  { %v1636_v31 = vadd.f32 %v1850_v35, %v1634_v30 }
0x2537   :  { %1646 = vrot.lane.b32.xlu0 %v1636_v31, %s1988_s28 }
0x25a9   :  { %v1647_v32 = vpop.permute.xlu0 %1646 }
0x25aa   :  { %1737 = vmatmul.msk.f32.vlgmr.msra.gmra.mxu0 %vm138_vm6, %v1647_v32 }
0x2627   :  { %v1667_v8 = vpop.f32.mrf.mxu0 }
0x2628   :  { %v1668_v43 = vadd.f32 %v1754_v33, %v1667_v8 }
0x262a   :  { %1671 = vst.msk [vmem:[#allocation11] sm:$0x3] %vm1670_vm10, %v1668_v43 }
0x262b   :  { %1682 = dma.vmem_to_hbm [thread:$0]  %s1678_s21, 32, %s1680_s24, [#allocation5]  }
0x262c   :  { %1978 = dma.done.wait [#allocation5], 32  }
0x262d   :  { %1979 = vsyncadd [#allocation5], 4294967264 }
0x262e   :  { %1687 = vsyncpa [#allocation4], 1 }
0x262f   :  { %1688 = vsyncpa [#allocation7], 1 }
0x2630   :  { %1689 = vsyncpa [#allocation10], 1 }
0x2631   :  { %1690 = vsyncpa [#allocation5], 1 }

</bundles_post_ra>
